<compile_context>
chip_gen: v7x
topology: tpu7x:2x2x1
jax: 0.10.0
libtpu: 0.0.40
codegen_flags: <defaults>
</compile_context>

<pallas_src>
import functools

import jax
import jax.numpy as jnp
import numpy as np
from jax.experimental import pallas as pl
from jax.experimental.pallas import tpu as pltpu


# Row indices of the packed (4, H) linear weight / bias arrays.
_ROW_STATIC, _ROW_OBS, _ROW_UNKNOWN, _ROW_KNOWN = 0, 1, 2, 3


def _tft_embedding_kernel(reg_ref, cat_ref, w_ref, b_ref, emb_ref, *out_refs,
                          obs_locs, unk_reg_locs, wired_cat_locs,
                          known_reg_locs, known_cat_locs,
                          static_reg_locs, static_cat_locs):
    """One grid step == one batch block; everything else is fused.

    reg_ref : (Bb, T, n_reg)          float32 regular inputs
    cat_ref : (Bb, T, n_cat)          int32 categorical codes
    w_ref   : (4, H)                  Linear(1,H) weights  [static, obs, unknown, known]
    b_ref   : (4, H)                  Linear(1,H) biases   [static, obs, unknown, known]
    emb_ref : (n_cat, max_count, H)   zero-padded embedding tables
    out_refs: [unknown?, known, obs, static?]
              time-distributed groups are (Bb, n_group, T, H); static is (Bb, n_static, H)
    """
    reg = reg_ref[...]                       # (Bb, T, n_reg)
    cat = cat_ref[...]                       # (Bb, T, n_cat) int32
    w = w_ref[...]                           # (4, H)
    bias = b_ref[...]                        # (4, H)
    blk_b, seq_t, _ = reg.shape
    max_count = emb_ref.shape[1]
    hidden = w.shape[1]

    refs = list(out_refs)
    has_unknown = (len(unk_reg_locs) + len(wired_cat_locs)) > 0
    has_static = (len(static_reg_locs) + len(static_cat_locs)) > 0
    unk_ref = refs.pop(0) if has_unknown else None
    known_ref = refs.pop(0)
    obs_ref = refs.pop(0)
    static_ref = refs.pop(0) if has_static else None

    # ---- embedding lookups: one batched one-hot matmul per needed cat var ----
    # one_hot(codes) @ table on the MXU with M = Bb*T rows; padded table rows
    # are all-zero so they never contribute.  HIGHEST keeps f32 tables exact.
    needed = sorted(set(wired_cat_locs) | set(known_cat_locs) | set(static_cat_locs))
    embs = {}
    if needed:
        iota = jax.lax.broadcasted_iota(jnp.int32, (blk_b, seq_t, max_count), 2)
        for ci in needed:
            onehot = (cat[:, :, ci:ci + 1] == iota).astype(jnp.float32)   # (Bb, T, C)
            e = jnp.dot(onehot.reshape(blk_b * seq_t, max_count), emb_ref[ci],
                        preferred_element_type=jnp.float32,
                        precision=jax.lax.Precision.HIGHEST)              # (Bb*T, H)
            embs[ci] = e.reshape(blk_b, seq_t, hidden)                    # (Bb, T, H)

    # ---- batched TimeDistributed(Linear(1,H)) per group, one dense store -----
    def store_group_linears(out_ref, locs, row):
        if not locs:
            return
        w_row = w[row]                                              # (H,), hoisted
        b_row = bias[row]                                           # (H,), hoisted
        cols = jnp.stack([reg[:, :, i] for i in locs], axis=1)      # (Bb, g, T)
        out_ref[:, 0:len(locs), :, :] = (
            cols[:, :, :, None] * w_row[None, None, None, :]
            + b_row[None, None, None, :])                           # (Bb, g, T, H)

    # ---- observed (target) inputs --------------------------------------------
    store_group_linears(obs_ref, obs_locs, _ROW_OBS)

    # ---- unknown inputs: unknown-regular linears, then "wired" embeddings ----
    if has_unknown:
        store_group_linears(unk_ref, unk_reg_locs, _ROW_UNKNOWN)
        off = len(unk_reg_locs)
        for j, ci in enumerate(wired_cat_locs):
            unk_ref[:, off + j, :, :] = embs[ci]

    # ---- known inputs: known-regular linears, then known embeddings ----------
    store_group_linears(known_ref, known_reg_locs, _ROW_KNOWN)
    off = len(known_reg_locs)
    for j, ci in enumerate(known_cat_locs):
        known_ref[:, off + j, :, :] = embs[ci]

    # ---- static inputs (time step 0 only) -------------------------------------
    if has_static:
        if static_reg_locs:
            w_st = w[_ROW_STATIC]                                   # (H,)
            b_st = bias[_ROW_STATIC]                                # (H,)
            cols0 = jnp.concatenate(
                [reg[:, 0:1, i] for i in static_reg_locs], axis=1)  # (Bb, g)
            static_ref[:, 0:len(static_reg_locs), :] = (
                cols0[:, :, None] * w_st[None, None, :] + b_st[None, None, :])
        off = len(static_reg_locs)
        for j, ci in enumerate(static_cat_locs):
            static_ref[:, off + j, :] = embs[ci][:, 0, :]


def tft_embedding_forward(all_inputs, params, config, *, block_b=None,
                          torch_layout=False):
    """Pallas forward of get_tft_embedding.

    Default layout (no extra HBM passes):
      unknown/known/obs : (B, n_vars, T, H)
      static            : (B, n_static, H)
    With torch_layout=True the time-distributed groups are transposed to
    torch's stack(axis=-1) layout (B, T, H, n_vars).
    """
    counts = list(config['category_counts'])
    n_cat = len(counts)
    n_reg = config['input_size'] - n_cat
    hidden = config['hidden_layer_size']
    static_loc = list(config['static_input_loc'])
    obs_loc = list(config['input_obs_loc'])
    known_reg = list(config['known_regular_inputs'])
    known_cat = list(config['known_categorical_inputs'])

    assert n_cat > 0 and n_reg > 0
    batch, seq_t, _ = all_inputs.shape

    # Group membership (mirrors the torch forward's list-comprehension order).
    obs_locs = tuple(obs_loc)
    unk_reg_locs = tuple(i for i in range(n_reg)
                         if i not in known_reg and i not in obs_loc)
    wired_cat_locs = tuple(i for i in range(n_cat)
                           if i not in known_cat and i + n_reg not in obs_loc)
    known_reg_locs = tuple(i for i in known_reg if i not in static_loc)
    known_cat_locs = tuple(i for i in known_cat if i + n_reg not in static_loc)
    static_reg_locs = tuple(i for i in range(n_reg) if i in static_loc)
    static_cat_locs = tuple(i for i in range(n_cat) if i + n_reg in static_loc)

    n_obs = len(obs_locs)
    n_unknown = len(unk_reg_locs) + len(wired_cat_locs)
    n_known = len(known_reg_locs) + len(known_cat_locs)
    n_static = len(static_reg_locs) + len(static_cat_locs)
    # torch.stack([]) would fail for these in the reference module as well.
    assert n_obs > 0 and n_known > 0

    # Split inputs exactly like the torch forward (.long() == int cast).
    reg = all_inputs[..., :n_reg].astype(jnp.float32)
    cat = all_inputs[..., n_reg:].astype(jnp.int32)

    # Pack the four Linear(1, H) layers as rows so the kernel never transposes.
    lin_w = jnp.stack([params['static_w'], params['obs_w'],
                       params['unknown_w'], params['known_w']], axis=0)   # (4, H)
    lin_b = jnp.stack([params['static_b'], params['obs_b'],
                       params['unknown_b'], params['known_b']], axis=0)   # (4, H)

    # Zero-pad embedding tables to a common row count and stack.
    max_count = max(counts)
    emb = jnp.zeros((n_cat, max_count, hidden), jnp.float32)
    for i, table in enumerate(params['emb_tables']):
        emb = emb.at[i, :counts[i], :].set(table.astype(jnp.float32))

    # ---- block_b selection: ~4 MiB blocks, >= 2 grid steps when possible -----
    row_bytes = 4 * (seq_t * (n_reg + n_cat)
                     + seq_t * (n_unknown + n_known + n_obs) * hidden
                     + n_static * hidden)
    if block_b is None:
        cap = max(1, (4 << 20) // max(row_bytes, 1))
        divisors = [d for d in range(1, batch + 1) if batch % d == 0]
        good = [d for d in divisors if d <= cap and batch // d >= 2]
        if good:
            block_b = max(good)
        else:
            small = [d for d in divisors if d <= cap]
            block_b = max(small) if small else 1
    assert batch % block_b == 0
    nb = batch // block_b

    # Conservative double-buffered footprint -> explicit scoped-VMEM limit,
    # capped well below v7x's 64 MiB physical VMEM.
    const_bytes = 4 * (2 * 4 * hidden + n_cat * max_count * hidden)
    footprint = 2 * block_b * row_bytes + 2 * const_bytes
    vmem_limit = int(min(48 << 20, max(32 << 20, footprint + (4 << 20))))

    kernel = functools.partial(
        _tft_embedding_kernel,
        obs_locs=obs_locs, unk_reg_locs=unk_reg_locs, wired_cat_locs=wired_cat_locs,
        known_reg_locs=known_reg_locs, known_cat_locs=known_cat_locs,
        static_reg_locs=static_reg_locs, static_cat_locs=static_cat_locs)

    out_shapes = []
    out_specs = []
    if n_unknown > 0:
        out_shapes.append(jax.ShapeDtypeStruct((batch, n_unknown, seq_t, hidden), jnp.float32))
        out_specs.append(pl.BlockSpec((block_b, n_unknown, seq_t, hidden),
                                      lambda b: (b, 0, 0, 0)))
    out_shapes.append(jax.ShapeDtypeStruct((batch, n_known, seq_t, hidden), jnp.float32))
    out_specs.append(pl.BlockSpec((block_b, n_known, seq_t, hidden),
                                  lambda b: (b, 0, 0, 0)))
    out_shapes.append(jax.ShapeDtypeStruct((batch, n_obs, seq_t, hidden), jnp.float32))
    out_specs.append(pl.BlockSpec((block_b, n_obs, seq_t, hidden),
                                  lambda b: (b, 0, 0, 0)))
    if n_static > 0:
        out_shapes.append(jax.ShapeDtypeStruct((batch, n_static, hidden), jnp.float32))
        out_specs.append(pl.BlockSpec((block_b, n_static, hidden),
                                      lambda b: (b, 0, 0)))

    def _call(single_buffer_consts):
        def const_spec(shape, imap):
            # Constant operands are never re-fetched; single-buffer them to
            # reclaim VMEM headroom (matters for large real-world TFT tables).
            if single_buffer_consts and hasattr(pl, "Buffered"):
                return pl.BlockSpec(shape, imap, pipeline_mode=pl.Buffered(1))
            return pl.BlockSpec(shape, imap)

        in_specs = [
            pl.BlockSpec((block_b, seq_t, n_reg), lambda b: (b, 0, 0)),     # regular
            pl.BlockSpec((block_b, seq_t, n_cat), lambda b: (b, 0, 0)),     # categorical
            const_spec((4, hidden), lambda b: (0, 0)),                      # linear weights
            const_spec((4, hidden), lambda b: (0, 0)),                      # linear biases
            const_spec((n_cat, max_count, hidden), lambda b: (0, 0, 0)),    # emb tables
        ]
        return pl.pallas_call(
            kernel,
            out_shape=tuple(out_shapes),
            grid_spec=pltpu.PrefetchScalarGridSpec(
                num_scalar_prefetch=0,
                grid=(nb,),
                in_specs=in_specs,
                out_specs=tuple(out_specs),
            ),
            compiler_params=pltpu.CompilerParams(
                dimension_semantics=("parallel",),
                vmem_limit_bytes=vmem_limit),
        )(reg, cat, lin_w, lin_b, emb)

    try:
        outs = _call(True)
    except Exception:
        # pl.Buffered(1) rejected by this jax version -> default double buffering.
        outs = _call(False)

    outs = list(outs)
    unknown = outs.pop(0) if n_unknown > 0 else None
    known = outs.pop(0)
    obs = outs.pop(0)
    static = outs.pop(0) if n_static > 0 else None

    if torch_layout:
        tr = lambda x: None if x is None else jnp.transpose(x, (0, 2, 3, 1))
        return tr(unknown), tr(known), tr(obs), static
    return unknown, known, obs, static


def _reference(all_inputs, params, config):
    """Pure-JAX transcription of the PyTorch forward (torch layouts)."""
    counts = list(config['category_counts'])
    n_cat = len(counts)
    n_reg = config['input_size'] - n_cat
    static_loc = list(config['static_input_loc'])
    obs_loc = list(config['input_obs_loc'])
    known_reg = list(config['known_regular_inputs'])
    known_cat = list(config['known_categorical_inputs'])

    regular = all_inputs[..., :n_reg].astype(jnp.float32)
    categorical = all_inputs[..., n_reg:].astype(jnp.int32)

    def lin(x, w, b):   # nn.Linear(1, H) on a trailing scalar feature
        return x * w + b

    embedded = [jnp.take(params['emb_tables'][i], categorical[..., i], axis=0)
                for i in range(n_cat)]

    if static_loc:
        st = []
        for i in range(n_reg):
            if i in static_loc:
                st.append(lin(regular[:, 0, i:i + 1], params['static_w'], params['static_b']))
        for i in range(n_cat):
            if i + n_reg in static_loc:
                st.append(embedded[i][:, 0, :])
        static_inputs = jnp.stack(st, axis=1)
    else:
        static_inputs = None

    obs_inputs = jnp.stack(
        [lin(regular[..., i:i + 1], params['obs_w'], params['obs_b']) for i in obs_loc],
        axis=-1)

    wired = [embedded[i] for i in range(n_cat)
             if i not in known_cat and i + n_reg not in obs_loc]
    unknown = [lin(regular[..., i:i + 1], params['unknown_w'], params['unknown_b'])
               for i in range(n_reg) if i not in known_reg and i not in obs_loc]
    unknown_inputs = jnp.stack(unknown + wired, axis=-1) if (unknown + wired) else None

    known_r = [lin(regular[..., i:i + 1], params['known_w'], params['known_b'])
               for i in known_reg if i not in static_loc]
    known_c = [embedded[i] for i in known_cat if i + n_reg not in static_loc]
    known_combined = jnp.stack(known_r + known_c, axis=-1)
    return unknown_inputs, known_combined, obs_inputs, static_inputs


if __name__ == "__main__":
    config = {
        'input_size': 6,
        'hidden_layer_size': 128,       # lane-dense hidden dim
        'category_counts': [10, 12],
        'static_input_loc': [0, 5],     # regular 0 + categorical 1 are static
        'input_obs_loc': [1],           # regular 1 is the observed target
        'known_regular_inputs': [0, 2],
        'known_categorical_inputs': [0],
    }
    B, T = 8, 8
    H = config['hidden_layer_size']
    counts = config['category_counts']
    n_cat = len(counts)
    n_reg = config['input_size'] - n_cat

    keys = jax.random.split(jax.random.PRNGKey(0), 13)

    reg_vals = jax.random.normal(keys[0], (B, T, n_reg), dtype=jnp.float32)
    cat_vals = jnp.stack(
        [jax.random.randint(keys[1 + i], (B, T), 0, counts[i]) for i in range(n_cat)],
        axis=-1).astype(jnp.float32)
    all_inputs = jnp.concatenate([reg_vals, cat_vals], axis=-1)   # (B, T, input_size)

    params = {
        'emb_tables': [0.1 * jax.random.normal(keys[3 + i], (counts[i], H), dtype=jnp.float32)
                       for i in range(n_cat)],
        # Linear(1, H): weight column (H,) == torch weight[:, 0], bias (H,)
        'static_w': 0.1 * jax.random.normal(keys[5], (H,), dtype=jnp.float32),
        'static_b': 0.1 * jax.random.normal(keys[6], (H,), dtype=jnp.float32),
        'obs_w': 0.1 * jax.random.normal(keys[7], (H,), dtype=jnp.float32),
        'obs_b': 0.1 * jax.random.normal(keys[8], (H,), dtype=jnp.float32),
        'unknown_w': 0.1 * jax.random.normal(keys[9], (H,), dtype=jnp.float32),
        'unknown_b': 0.1 * jax.random.normal(keys[10], (H,), dtype=jnp.float32),
        'known_w': 0.1 * jax.random.normal(keys[11], (H,), dtype=jnp.float32),
        'known_b': 0.1 * jax.random.normal(keys[12], (H,), dtype=jnp.float32),
    }

    # block_b=2 -> 4 grid steps: shards across v7x's two cores and pipelines.
    unknown, known, obs, static = tft_embedding_forward(
        all_inputs, params, config, block_b=2)
    unknown = jax.block_until_ready(unknown)
    known = jax.block_until_ready(known)
    obs = jax.block_until_ready(obs)
    static = jax.block_until_ready(static)

    r_unknown, r_known, r_obs, r_static = _reference(all_inputs, params, config)
    # Kernel layout is (B, n_vars, T, H); torch reference is (B, T, H, n_vars).
    to_kernel = lambda x: jnp.transpose(x, (0, 3, 1, 2))
    np.testing.assert_allclose(np.asarray(unknown), np.asarray(to_kernel(r_unknown)),
                               rtol=1e-5, atol=1e-5)
    np.testing.assert_allclose(np.asarray(known), np.asarray(to_kernel(r_known)),
                               rtol=1e-5, atol=1e-5)
    np.testing.assert_allclose(np.asarray(obs), np.asarray(to_kernel(r_obs)),
                               rtol=1e-5, atol=1e-5)
    np.testing.assert_allclose(np.asarray(static), np.asarray(r_static),
                               rtol=1e-5, atol=1e-5)

    print("KERNEL_OK")
</pallas_src>

<mosaic_0001>
module attributes {stable_mosaic.version = 11 : i64} {
  func.func @_tft_embedding_kernel(%arg0: i32, %arg1: memref<2x8x4xf32, #tpu.memory_space<vmem>>, %arg2: memref<2x8x2xi32, #tpu.memory_space<vmem>>, %arg3: memref<4x128xf32, #tpu.memory_space<vmem>>, %arg4: memref<4x128xf32, #tpu.memory_space<vmem>>, %arg5: memref<2x12x128xf32, #tpu.memory_space<vmem>>, %arg6: memref<2x2x8x128xf32, #tpu.memory_space<vmem>>, %arg7: memref<2x2x8x128xf32, #tpu.memory_space<vmem>>, %arg8: memref<2x1x8x128xf32, #tpu.memory_space<vmem>>, %arg9: memref<2x2x128xf32, #tpu.memory_space<vmem>>) attributes {dimension_semantics = [#tpu.dimension_semantics<parallel>], iteration_bounds = array<i64: 4>, scalar_prefetch = 0 : i64, scratch_operands = 0 : i64, tpu.core_type = #tpu.core_type<tc>, window_params = [{transform_indices = @transform_0, window_bounds = array<i64: 2, 8, 4>}, {transform_indices = @transform_1, window_bounds = array<i64: 2, 8, 2>}, {pipeline_mode = #tpu.pipeline_mode<synchronous>, transform_indices = @transform_2, window_bounds = array<i64: 4, 128>}, {pipeline_mode = #tpu.pipeline_mode<synchronous>, transform_indices = @transform_3, window_bounds = array<i64: 4, 128>}, {pipeline_mode = #tpu.pipeline_mode<synchronous>, transform_indices = @transform_4, window_bounds = array<i64: 2, 12, 128>}, {transform_indices = @transform_5, window_bounds = array<i64: 2, 2, 8, 128>}, {transform_indices = @transform_6, window_bounds = array<i64: 2, 2, 8, 128>}, {transform_indices = @transform_7, window_bounds = array<i64: 2, 1, 8, 128>}, {transform_indices = @transform_8, window_bounds = array<i64: 2, 2, 128>}]} {
    %c0 = arith.constant 0 : index
    %c0_0 = arith.constant 0 : index
    %c0_1 = arith.constant 0 : index
    %0 = vector.load %arg1[%c0, %c0_0, %c0_1] : memref<2x8x4xf32, #tpu.memory_space<vmem>>, vector<2x8x4xf32>
    %c0_2 = arith.constant 0 : index
    %c0_3 = arith.constant 0 : index
    %c0_4 = arith.constant 0 : index
    %1 = vector.load %arg2[%c0_2, %c0_3, %c0_4] : memref<2x8x2xi32, #tpu.memory_space<vmem>>, vector<2x8x2xi32>
    %c0_5 = arith.constant 0 : index
    %c0_6 = arith.constant 0 : index
    %2 = vector.load %arg3[%c0_5, %c0_6] : memref<4x128xf32, #tpu.memory_space<vmem>>, vector<4x128xf32>
    %c0_7 = arith.constant 0 : index
    %c0_8 = arith.constant 0 : index
    %3 = vector.load %arg4[%c0_7, %c0_8] : memref<4x128xf32, #tpu.memory_space<vmem>>, vector<4x128xf32>
    %4 = tpu.iota {dimensions = array<i32: 2>} : vector<2x8x12xi32>
    %5 = vector.extract_strided_slice %1 {offsets = [0, 0, 0], sizes = [2, 8, 1], strides = [1, 1, 1]} : vector<2x8x2xi32> to vector<2x8x1xi32>
    %6 = vector.broadcast %5 : vector<2x8x1xi32> to vector<2x8x12xi32>
    %7 = arith.cmpi eq, %6, %4 : vector<2x8x12xi32>
    %8 = arith.extui %7 : vector<2x8x12xi1> to vector<2x8x12xi32>
    %9 = arith.sitofp %8 : vector<2x8x12xi32> to vector<2x8x12xf32>
    %10 = vector.shape_cast %9 : vector<2x8x12xf32> to vector<16x12xf32>
    %c0_9 = arith.constant 0 : index
    %c0_10 = arith.constant 0 : index
    %c0_11 = arith.constant 0 : index
    %11 = vector.load %arg5[%c0_9, %c0_10, %c0_11] : memref<2x12x128xf32, #tpu.memory_space<vmem>>, vector<1x12x128xf32>
    %12 = vector.shape_cast %11 : vector<1x12x128xf32> to vector<12x128xf32>
    %cst = arith.constant dense<0.000000e+00> : vector<16x128xf32>
    %13 = tpu.matmul %10, %12, %cst {dimension_numbers = #tpu.dot_dimension_numbers<[1], [0], [0], [1], [0, 0, 1, 1], [], []>, precision = #tpu.contract_precision<fp32>} : vector<16x12xf32>, vector<12x128xf32>, vector<16x128xf32> -> vector<16x128xf32>
    %14 = vector.shape_cast %13 : vector<16x128xf32> to vector<2x8x128xf32>
    %15 = vector.extract_strided_slice %1 {offsets = [0, 0, 1], sizes = [2, 8, 1], strides = [1, 1, 1]} : vector<2x8x2xi32> to vector<2x8x1xi32>
    %16 = vector.broadcast %15 : vector<2x8x1xi32> to vector<2x8x12xi32>
    %17 = arith.cmpi eq, %16, %4 : vector<2x8x12xi32>
    %18 = arith.extui %17 : vector<2x8x12xi1> to vector<2x8x12xi32>
    %19 = arith.sitofp %18 : vector<2x8x12xi32> to vector<2x8x12xf32>
    %20 = vector.shape_cast %19 : vector<2x8x12xf32> to vector<16x12xf32>
    %c1 = arith.constant 1 : index
    %c0_12 = arith.constant 0 : index
    %c0_13 = arith.constant 0 : index
    %21 = vector.load %arg5[%c1, %c0_12, %c0_13] : memref<2x12x128xf32, #tpu.memory_space<vmem>>, vector<1x12x128xf32>
    %22 = vector.shape_cast %21 : vector<1x12x128xf32> to vector<12x128xf32>
    %cst_14 = arith.constant dense<0.000000e+00> : vector<16x128xf32>
    %23 = tpu.matmul %20, %22, %cst_14 {dimension_numbers = #tpu.dot_dimension_numbers<[1], [0], [0], [1], [0, 0, 1, 1], [], []>, precision = #tpu.contract_precision<fp32>} : vector<16x12xf32>, vector<12x128xf32>, vector<16x128xf32> -> vector<16x128xf32>
    %24 = vector.shape_cast %23 : vector<16x128xf32> to vector<2x8x128xf32>
    %25 = vector.extract_strided_slice %2 {offsets = [1, 0], sizes = [1, 128], strides = [1, 1]} : vector<4x128xf32> to vector<1x128xf32>
    %26 = vector.shape_cast %25 : vector<1x128xf32> to vector<128xf32>
    %27 = vector.extract_strided_slice %3 {offsets = [1, 0], sizes = [1, 128], strides = [1, 1]} : vector<4x128xf32> to vector<1x128xf32>
    %28 = vector.shape_cast %27 : vector<1x128xf32> to vector<128xf32>
    %29 = vector.extract_strided_slice %0 {offsets = [0, 0, 1], sizes = [2, 8, 1], strides = [1, 1, 1]} : vector<2x8x4xf32> to vector<2x8x1xf32>
    %30 = vector.shape_cast %29 : vector<2x8x1xf32> to vector<2x8xf32>
    %31 = vector.shape_cast %30 : vector<2x8xf32> to vector<2x1x8xf32>
    %32 = vector.shape_cast %31 : vector<2x1x8xf32> to vector<2x1x8x1xf32>
    %33 = vector.shape_cast %26 : vector<128xf32> to vector<1x1x1x128xf32>
    %34 = vector.broadcast %32 : vector<2x1x8x1xf32> to vector<2x1x8x128xf32>
    %35 = vector.broadcast %33 : vector<1x1x1x128xf32> to vector<2x1x8x128xf32>
    %36 = arith.mulf %34, %35 : vector<2x1x8x128xf32>
    %37 = vector.shape_cast %28 : vector<128xf32> to vector<1x1x1x128xf32>
    %38 = vector.broadcast %37 : vector<1x1x1x128xf32> to vector<2x1x8x128xf32>
    %39 = arith.addf %36, %38 : vector<2x1x8x128xf32>
    %c0_15 = arith.constant 0 : index
    %c0_16 = arith.constant 0 : index
    %c0_17 = arith.constant 0 : index
    %c0_18 = arith.constant 0 : index
    %40 = vector.load %arg8[%c0_15, %c0_16, %c0_17, %c0_18] : memref<2x1x8x128xf32, #tpu.memory_space<vmem>>, vector<2x1x8x128xf32>
    tpu.vector_store %arg8[%c0_15, %c0_16, %c0_17, %c0_18], %39 {strides = array<i32>} : memref<2x1x8x128xf32, #tpu.memory_space<vmem>>, vector<2x1x8x128xf32>,
    %41 = vector.extract_strided_slice %2 {offsets = [2, 0], sizes = [1, 128], strides = [1, 1]} : vector<4x128xf32> to vector<1x128xf32>
    %42 = vector.shape_cast %41 : vector<1x128xf32> to vector<128xf32>
    %43 = vector.extract_strided_slice %3 {offsets = [2, 0], sizes = [1, 128], strides = [1, 1]} : vector<4x128xf32> to vector<1x128xf32>
    %44 = vector.shape_cast %43 : vector<1x128xf32> to vector<128xf32>
    %45 = vector.extract_strided_slice %0 {offsets = [0, 0, 3], sizes = [2, 8, 1], strides = [1, 1, 1]} : vector<2x8x4xf32> to vector<2x8x1xf32>
    %46 = vector.shape_cast %45 : vector<2x8x1xf32> to vector<2x8xf32>
    %47 = vector.shape_cast %46 : vector<2x8xf32> to vector<2x1x8xf32>
    %48 = vector.shape_cast %47 : vector<2x1x8xf32> to vector<2x1x8x1xf32>
    %49 = vector.shape_cast %42 : vector<128xf32> to vector<1x1x1x128xf32>
    %50 = vector.broadcast %48 : vector<2x1x8x1xf32> to vector<2x1x8x128xf32>
    %51 = vector.broadcast %49 : vector<1x1x1x128xf32> to vector<2x1x8x128xf32>
    %52 = arith.mulf %50, %51 : vector<2x1x8x128xf32>
    %53 = vector.shape_cast %44 : vector<128xf32> to vector<1x1x1x128xf32>
    %54 = vector.broadcast %53 : vector<1x1x1x128xf32> to vector<2x1x8x128xf32>
    %55 = arith.addf %52, %54 : vector<2x1x8x128xf32>
    %c0_19 = arith.constant 0 : index
    %c0_20 = arith.constant 0 : index
    %c0_21 = arith.constant 0 : index
    %c0_22 = arith.constant 0 : index
    %56 = vector.load %arg6[%c0_19, %c0_20, %c0_21, %c0_22] : memref<2x2x8x128xf32, #tpu.memory_space<vmem>>, vector<2x1x8x128xf32>
    tpu.vector_store %arg6[%c0_19, %c0_20, %c0_21, %c0_22], %55 {strides = array<i32>} : memref<2x2x8x128xf32, #tpu.memory_space<vmem>>, vector<2x1x8x128xf32>,
    %c0_23 = arith.constant 0 : index
    %c1_24 = arith.constant 1 : index
    %c0_25 = arith.constant 0 : index
    %c0_26 = arith.constant 0 : index
    %57 = vector.load %arg6[%c0_23, %c1_24, %c0_25, %c0_26] : memref<2x2x8x128xf32, #tpu.memory_space<vmem>>, vector<2x1x8x128xf32>
    %58 = vector.shape_cast %57 : vector<2x1x8x128xf32> to vector<2x8x128xf32>
    %59 = vector.shape_cast %24 : vector<2x8x128xf32> to vector<2x1x8x128xf32>
    tpu.vector_store %arg6[%c0_23, %c1_24, %c0_25, %c0_26], %59 {strides = array<i32>} : memref<2x2x8x128xf32, #tpu.memory_space<vmem>>, vector<2x1x8x128xf32>,
    %60 = vector.extract_strided_slice %2 {offsets = [3, 0], sizes = [1, 128], strides = [1, 1]} : vector<4x128xf32> to vector<1x128xf32>
    %61 = vector.shape_cast %60 : vector<1x128xf32> to vector<128xf32>
    %62 = vector.extract_strided_slice %3 {offsets = [3, 0], sizes = [1, 128], strides = [1, 1]} : vector<4x128xf32> to vector<1x128xf32>
    %63 = vector.shape_cast %62 : vector<1x128xf32> to vector<128xf32>
    %64 = vector.extract_strided_slice %0 {offsets = [0, 0, 2], sizes = [2, 8, 1], strides = [1, 1, 1]} : vector<2x8x4xf32> to vector<2x8x1xf32>
    %65 = vector.shape_cast %64 : vector<2x8x1xf32> to vector<2x8xf32>
    %66 = vector.shape_cast %65 : vector<2x8xf32> to vector<2x1x8xf32>
    %67 = vector.shape_cast %66 : vector<2x1x8xf32> to vector<2x1x8x1xf32>
    %68 = vector.shape_cast %61 : vector<128xf32> to vector<1x1x1x128xf32>
    %69 = vector.broadcast %67 : vector<2x1x8x1xf32> to vector<2x1x8x128xf32>
    %70 = vector.broadcast %68 : vector<1x1x1x128xf32> to vector<2x1x8x128xf32>
    %71 = arith.mulf %69, %70 : vector<2x1x8x128xf32>
    %72 = vector.shape_cast %63 : vector<128xf32> to vector<1x1x1x128xf32>
    %73 = vector.broadcast %72 : vector<1x1x1x128xf32> to vector<2x1x8x128xf32>
    %74 = arith.addf %71, %73 : vector<2x1x8x128xf32>
    %c0_27 = arith.constant 0 : index
    %c0_28 = arith.constant 0 : index
    %c0_29 = arith.constant 0 : index
    %c0_30 = arith.constant 0 : index
    %75 = vector.load %arg7[%c0_27, %c0_28, %c0_29, %c0_30] : memref<2x2x8x128xf32, #tpu.memory_space<vmem>>, vector<2x1x8x128xf32>
    tpu.vector_store %arg7[%c0_27, %c0_28, %c0_29, %c0_30], %74 {strides = array<i32>} : memref<2x2x8x128xf32, #tpu.memory_space<vmem>>, vector<2x1x8x128xf32>,
    %c0_31 = arith.constant 0 : index
    %c1_32 = arith.constant 1 : index
    %c0_33 = arith.constant 0 : index
    %c0_34 = arith.constant 0 : index
    %76 = vector.load %arg7[%c0_31, %c1_32, %c0_33, %c0_34] : memref<2x2x8x128xf32, #tpu.memory_space<vmem>>, vector<2x1x8x128xf32>
    %77 = vector.shape_cast %76 : vector<2x1x8x128xf32> to vector<2x8x128xf32>
    %78 = vector.shape_cast %14 : vector<2x8x128xf32> to vector<2x1x8x128xf32>
    tpu.vector_store %arg7[%c0_31, %c1_32, %c0_33, %c0_34], %78 {strides = array<i32>} : memref<2x2x8x128xf32, #tpu.memory_space<vmem>>, vector<2x1x8x128xf32>,
    %79 = vector.extract_strided_slice %2 {offsets = [0, 0], sizes = [1, 128], strides = [1, 1]} : vector<4x128xf32> to vector<1x128xf32>
    %80 = vector.shape_cast %79 : vector<1x128xf32> to vector<128xf32>
    %81 = vector.extract_strided_slice %3 {offsets = [0, 0], sizes = [1, 128], strides = [1, 1]} : vector<4x128xf32> to vector<1x128xf32>
    %82 = vector.shape_cast %81 : vector<1x128xf32> to vector<128xf32>
    %83 = vector.extract_strided_slice %0 {offsets = [0, 0, 0], sizes = [2, 1, 1], strides = [1, 1, 1]} : vector<2x8x4xf32> to vector<2x1x1xf32>
    %84 = vector.shape_cast %83 : vector<2x1x1xf32> to vector<2x1xf32>
    %85 = vector.shape_cast %84 : vector<2x1xf32> to vector<2x1x1xf32>
    %86 = vector.shape_cast %80 : vector<128xf32> to vector<1x1x128xf32>
    %87 = vector.broadcast %85 : vector<2x1x1xf32> to vector<2x1x128xf32>
    %88 = vector.broadcast %86 : vector<1x1x128xf32> to vector<2x1x128xf32>
    %89 = arith.mulf %87, %88 : vector<2x1x128xf32>
    %90 = vector.shape_cast %82 : vector<128xf32> to vector<1x1x128xf32>
    %91 = vector.broadcast %90 : vector<1x1x128xf32> to vector<2x1x128xf32>
    %92 = arith.addf %89, %91 : vector<2x1x128xf32>
    %c0_35 = arith.constant 0 : index
    %c0_36 = arith.constant 0 : index
    %c0_37 = arith.constant 0 : index
    %93 = vector.load %arg9[%c0_35, %c0_36, %c0_37] : memref<2x2x128xf32, #tpu.memory_space<vmem>>, vector<2x1x128xf32>
    tpu.vector_store %arg9[%c0_35, %c0_36, %c0_37], %92 {strides = array<i32>} : memref<2x2x128xf32, #tpu.memory_space<vmem>>, vector<2x1x128xf32>,
    %94 = vector.extract_strided_slice %24 {offsets = [0, 0, 0], sizes = [2, 1, 128], strides = [1, 1, 1]} : vector<2x8x128xf32> to vector<2x1x128xf32>
    %95 = vector.shape_cast %94 : vector<2x1x128xf32> to vector<2x128xf32>
    %c0_38 = arith.constant 0 : index
    %c1_39 = arith.constant 1 : index
    %c0_40 = arith.constant 0 : index
    %96 = vector.load %arg9[%c0_38, %c1_39, %c0_40] : memref<2x2x128xf32, #tpu.memory_space<vmem>>, vector<2x1x128xf32>
    %97 = vector.shape_cast %96 : vector<2x1x128xf32> to vector<2x128xf32>
    %98 = vector.shape_cast %95 : vector<2x128xf32> to vector<2x1x128xf32>
    tpu.vector_store %arg9[%c0_38, %c1_39, %c0_40], %98 {strides = array<i32>} : memref<2x2x128xf32, #tpu.memory_space<vmem>>, vector<2x1x128xf32>,
    return
  }
  func.func @transform_0(%arg0: i32) -> (i32, i32, i32) {
    %c0_i32 = arith.constant 0 : i32
    %c0_i32_0 = arith.constant 0 : i32
    %c0_i32_1 = arith.constant 0 : i32
    return %arg0, %c0_i32, %c0_i32_0 : i32, i32, i32
  }
  func.func @transform_1(%arg0: i32) -> (i32, i32, i32) {
    %c0_i32 = arith.constant 0 : i32
    %c0_i32_0 = arith.constant 0 : i32
    %c0_i32_1 = arith.constant 0 : i32
    return %arg0, %c0_i32, %c0_i32_0 : i32, i32, i32
  }
  func.func @transform_2(%arg0: i32) -> (i32, i32) {
    %c0_i32 = arith.constant 0 : i32
    %c0_i32_0 = arith.constant 0 : i32
    %c0_i32_1 = arith.constant 0 : i32
    return %c0_i32, %c0_i32_0 : i32, i32
  }
  func.func @transform_3(%arg0: i32) -> (i32, i32) {
    %c0_i32 = arith.constant 0 : i32
    %c0_i32_0 = arith.constant 0 : i32
    %c0_i32_1 = arith.constant 0 : i32
    return %c0_i32, %c0_i32_0 : i32, i32
  }
  func.func @transform_4(%arg0: i32) -> (i32, i32, i32) {
    %c0_i32 = arith.constant 0 : i32
    %c0_i32_0 = arith.constant 0 : i32
    %c0_i32_1 = arith.constant 0 : i32
    %c0_i32_2 = arith.constant 0 : i32
    return %c0_i32, %c0_i32_0, %c0_i32_1 : i32, i32, i32
  }
  func.func @transform_5(%arg0: i32) -> (i32, i32, i32, i32) {
    %c0_i32 = arith.constant 0 : i32
    %c0_i32_0 = arith.constant 0 : i32
    %c0_i32_1 = arith.constant 0 : i32
    %c0_i32_2 = arith.constant 0 : i32
    return %arg0, %c0_i32, %c0_i32_0, %c0_i32_1 : i32, i32, i32, i32
  }
  func.func @transform_6(%arg0: i32) -> (i32, i32, i32, i32) {
    %c0_i32 = arith.constant 0 : i32
    %c0_i32_0 = arith.constant 0 : i32
    %c0_i32_1 = arith.constant 0 : i32
    %c0_i32_2 = arith.constant 0 : i32
    return %arg0, %c0_i32, %c0_i32_0, %c0_i32_1 : i32, i32, i32, i32
  }
  func.func @transform_7(%arg0: i32) -> (i32, i32, i32, i32) {
    %c0_i32 = arith.constant 0 : i32
    %c0_i32_0 = arith.constant 0 : i32
    %c0_i32_1 = arith.constant 0 : i32
    %c0_i32_2 = arith.constant 0 : i32
    return %arg0, %c0_i32, %c0_i32_0, %c0_i32_1 : i32, i32, i32, i32
  }
  func.func @transform_8(%arg0: i32) -> (i32, i32, i32) {
    %c0_i32 = arith.constant 0 : i32
    %c0_i32_0 = arith.constant 0 : i32
    %c0_i32_1 = arith.constant 0 : i32
    return %arg0, %c0_i32, %c0_i32_0 : i32, i32, i32
  }
}

module attributes {stable_mosaic.version = 11 : i64} {
  func.func @_tft_embedding_kernel(%arg0: i32, %arg1: memref<2x8x4xf32, #tpu.memory_space<vmem>>, %arg2: memref<2x8x2xi32, #tpu.memory_space<vmem>>, %arg3: memref<4x128xf32, #tpu.memory_space<vmem>>, %arg4: memref<4x128xf32, #tpu.memory_space<vmem>>, %arg5: memref<2x12x128xf32, #tpu.memory_space<vmem>>, %arg6: memref<2x2x8x128xf32, #tpu.memory_space<vmem>>, %arg7: memref<2x2x8x128xf32, #tpu.memory_space<vmem>>, %arg8: memref<2x1x8x128xf32, #tpu.memory_space<vmem>>, %arg9: memref<2x2x128xf32, #tpu.memory_space<vmem>>) attributes {dimension_semantics = [#tpu.dimension_semantics<parallel>], iteration_bounds = array<i64: 4>, scalar_prefetch = 0 : i64, scratch_operands = 0 : i64, tpu.core_type = #tpu.core_type<tc>, window_params = [{transform_indices = @transform_0, window_bounds = array<i64: 2, 8, 4>}, {transform_indices = @transform_1, window_bounds = array<i64: 2, 8, 2>}, {pipeline_mode = #tpu.pipeline_mode<synchronous>, transform_indices = @transform_2, window_bounds = array<i64: 4, 128>}, {pipeline_mode = #tpu.pipeline_mode<synchronous>, transform_indices = @transform_3, window_bounds = array<i64: 4, 128>}, {pipeline_mode = #tpu.pipeline_mode<synchronous>, transform_indices = @transform_4, window_bounds = array<i64: 2, 12, 128>}, {transform_indices = @transform_5, window_bounds = array<i64: 2, 2, 8, 128>}, {transform_indices = @transform_6, window_bounds = array<i64: 2, 2, 8, 128>}, {transform_indices = @transform_7, window_bounds = array<i64: 2, 1, 8, 128>}, {transform_indices = @transform_8, window_bounds = array<i64: 2, 2, 128>}]} {
    %c0 = arith.constant 0 : index
    %c0_0 = arith.constant 0 : index
    %c0_1 = arith.constant 0 : index
    %0 = vector.load %arg1[%c0, %c0_0, %c0_1] : memref<2x8x4xf32, #tpu.memory_space<vmem>>, vector<2x8x4xf32>
    %c0_2 = arith.constant 0 : index
    %c0_3 = arith.constant 0 : index
    %c0_4 = arith.constant 0 : index
    %1 = vector.load %arg2[%c0_2, %c0_3, %c0_4] : memref<2x8x2xi32, #tpu.memory_space<vmem>>, vector<2x8x2xi32>
    %c0_5 = arith.constant 0 : index
    %c0_6 = arith.constant 0 : index
    %2 = vector.load %arg3[%c0_5, %c0_6] : memref<4x128xf32, #tpu.memory_space<vmem>>, vector<4x128xf32>
    %c0_7 = arith.constant 0 : index
    %c0_8 = arith.constant 0 : index
    %3 = vector.load %arg4[%c0_7, %c0_8] : memref<4x128xf32, #tpu.memory_space<vmem>>, vector<4x128xf32>
    %4 = tpu.iota {dimensions = array<i32: 2>} : vector<2x8x12xi32>
    %5 = vector.extract_strided_slice %1 {offsets = [0, 0, 0], sizes = [2, 8, 1], strides = [1, 1, 1]} : vector<2x8x2xi32> to vector<2x8x1xi32>
    %6 = vector.broadcast %5 : vector<2x8x1xi32> to vector<2x8x12xi32>
    %7 = arith.cmpi eq, %6, %4 : vector<2x8x12xi32>
    %8 = arith.extui %7 : vector<2x8x12xi1> to vector<2x8x12xi32>
    %9 = arith.sitofp %8 : vector<2x8x12xi32> to vector<2x8x12xf32>
    %10 = vector.shape_cast %9 : vector<2x8x12xf32> to vector<16x12xf32>
    %c0_9 = arith.constant 0 : index
    %c0_10 = arith.constant 0 : index
    %c0_11 = arith.constant 0 : index
    %11 = vector.load %arg5[%c0_9, %c0_10, %c0_11] : memref<2x12x128xf32, #tpu.memory_space<vmem>>, vector<1x12x128xf32>
    %12 = vector.shape_cast %11 : vector<1x12x128xf32> to vector<12x128xf32>
    %cst = arith.constant dense<0.000000e+00> : vector<16x128xf32>
    %13 = tpu.matmul %10, %12, %cst {dimension_numbers = #tpu.dot_dimension_numbers<[1], [0], [0], [1], [0, 0, 1, 1], [], []>, precision = #tpu.contract_precision<fp32>} : vector<16x12xf32>, vector<12x128xf32>, vector<16x128xf32> -> vector<16x128xf32>
    %14 = vector.shape_cast %13 : vector<16x128xf32> to vector<2x8x128xf32>
    %15 = vector.extract_strided_slice %1 {offsets = [0, 0, 1], sizes = [2, 8, 1], strides = [1, 1, 1]} : vector<2x8x2xi32> to vector<2x8x1xi32>
    %16 = vector.broadcast %15 : vector<2x8x1xi32> to vector<2x8x12xi32>
    %17 = arith.cmpi eq, %16, %4 : vector<2x8x12xi32>
    %18 = arith.extui %17 : vector<2x8x12xi1> to vector<2x8x12xi32>
    %19 = arith.sitofp %18 : vector<2x8x12xi32> to vector<2x8x12xf32>
    %20 = vector.shape_cast %19 : vector<2x8x12xf32> to vector<16x12xf32>
    %c1 = arith.constant 1 : index
    %c0_12 = arith.constant 0 : index
    %c0_13 = arith.constant 0 : index
    %21 = vector.load %arg5[%c1, %c0_12, %c0_13] : memref<2x12x128xf32, #tpu.memory_space<vmem>>, vector<1x12x128xf32>
    %22 = vector.shape_cast %21 : vector<1x12x128xf32> to vector<12x128xf32>
    %cst_14 = arith.constant dense<0.000000e+00> : vector<16x128xf32>
    %23 = tpu.matmul %20, %22, %cst_14 {dimension_numbers = #tpu.dot_dimension_numbers<[1], [0], [0], [1], [0, 0, 1, 1], [], []>, precision = #tpu.contract_precision<fp32>} : vector<16x12xf32>, vector<12x128xf32>, vector<16x128xf32> -> vector<16x128xf32>
    %24 = vector.shape_cast %23 : vector<16x128xf32> to vector<2x8x128xf32>
    %25 = vector.extract_strided_slice %2 {offsets = [1, 0], sizes = [1, 128], strides = [1, 1]} : vector<4x128xf32> to vector<1x128xf32>
    %26 = vector.shape_cast %25 : vector<1x128xf32> to vector<128xf32>
    %27 = vector.extract_strided_slice %3 {offsets = [1, 0], sizes = [1, 128], strides = [1, 1]} : vector<4x128xf32> to vector<1x128xf32>
    %28 = vector.shape_cast %27 : vector<1x128xf32> to vector<128xf32>
    %29 = vector.extract_strided_slice %0 {offsets = [0, 0, 1], sizes = [2, 8, 1], strides = [1, 1, 1]} : vector<2x8x4xf32> to vector<2x8x1xf32>
    %30 = vector.shape_cast %29 : vector<2x8x1xf32> to vector<2x8xf32>
    %31 = vector.shape_cast %30 : vector<2x8xf32> to vector<2x1x8xf32>
    %32 = vector.shape_cast %31 : vector<2x1x8xf32> to vector<2x1x8x1xf32>
    %33 = vector.shape_cast %26 : vector<128xf32> to vector<1x1x1x128xf32>
    %34 = vector.broadcast %32 : vector<2x1x8x1xf32> to vector<2x1x8x128xf32>
    %35 = vector.broadcast %33 : vector<1x1x1x128xf32> to vector<2x1x8x128xf32>
    %36 = arith.mulf %34, %35 : vector<2x1x8x128xf32>
    %37 = vector.shape_cast %28 : vector<128xf32> to vector<1x1x1x128xf32>
    %38 = vector.broadcast %37 : vector<1x1x1x128xf32> to vector<2x1x8x128xf32>
    %39 = arith.addf %36, %38 : vector<2x1x8x128xf32>
    %c0_15 = arith.constant 0 : index
    %c0_16 = arith.constant 0 : index
    %c0_17 = arith.constant 0 : index
    %c0_18 = arith.constant 0 : index
    %40 = vector.load %arg8[%c0_15, %c0_16, %c0_17, %c0_18] : memref<2x1x8x128xf32, #tpu.memory_space<vmem>>, vector<2x1x8x128xf32>
    tpu.vector_store %arg8[%c0_15, %c0_16, %c0_17, %c0_18], %39 {strides = array<i32>} : memref<2x1x8x128xf32, #tpu.memory_space<vmem>>, vector<2x1x8x128xf32>,
    %41 = vector.extract_strided_slice %2 {offsets = [2, 0], sizes = [1, 128], strides = [1, 1]} : vector<4x128xf32> to vector<1x128xf32>
    %42 = vector.shape_cast %41 : vector<1x128xf32> to vector<128xf32>
    %43 = vector.extract_strided_slice %3 {offsets = [2, 0], sizes = [1, 128], strides = [1, 1]} : vector<4x128xf32> to vector<1x128xf32>
    %44 = vector.shape_cast %43 : vector<1x128xf32> to vector<128xf32>
    %45 = vector.extract_strided_slice %0 {offsets = [0, 0, 3], sizes = [2, 8, 1], strides = [1, 1, 1]} : vector<2x8x4xf32> to vector<2x8x1xf32>
    %46 = vector.shape_cast %45 : vector<2x8x1xf32> to vector<2x8xf32>
    %47 = vector.shape_cast %46 : vector<2x8xf32> to vector<2x1x8xf32>
    %48 = vector.shape_cast %47 : vector<2x1x8xf32> to vector<2x1x8x1xf32>
    %49 = vector.shape_cast %42 : vector<128xf32> to vector<1x1x1x128xf32>
    %50 = vector.broadcast %48 : vector<2x1x8x1xf32> to vector<2x1x8x128xf32>
    %51 = vector.broadcast %49 : vector<1x1x1x128xf32> to vector<2x1x8x128xf32>
    %52 = arith.mulf %50, %51 : vector<2x1x8x128xf32>
    %53 = vector.shape_cast %44 : vector<128xf32> to vector<1x1x1x128xf32>
    %54 = vector.broadcast %53 : vector<1x1x1x128xf32> to vector<2x1x8x128xf32>
    %55 = arith.addf %52, %54 : vector<2x1x8x128xf32>
    %c0_19 = arith.constant 0 : index
    %c0_20 = arith.constant 0 : index
    %c0_21 = arith.constant 0 : index
    %c0_22 = arith.constant 0 : index
    %56 = vector.load %arg6[%c0_19, %c0_20, %c0_21, %c0_22] : memref<2x2x8x128xf32, #tpu.memory_space<vmem>>, vector<2x1x8x128xf32>
    tpu.vector_store %arg6[%c0_19, %c0_20, %c0_21, %c0_22], %55 {strides = array<i32>} : memref<2x2x8x128xf32, #tpu.memory_space<vmem>>, vector<2x1x8x128xf32>,
    %c0_23 = arith.constant 0 : index
    %c1_24 = arith.constant 1 : index
    %c0_25 = arith.constant 0 : index
    %c0_26 = arith.constant 0 : index
    %57 = vector.load %arg6[%c0_23, %c1_24, %c0_25, %c0_26] : memref<2x2x8x128xf32, #tpu.memory_space<vmem>>, vector<2x1x8x128xf32>
    %58 = vector.shape_cast %57 : vector<2x1x8x128xf32> to vector<2x8x128xf32>
    %59 = vector.shape_cast %24 : vector<2x8x128xf32> to vector<2x1x8x128xf32>
    tpu.vector_store %arg6[%c0_23, %c1_24, %c0_25, %c0_26], %59 {strides = array<i32>} : memref<2x2x8x128xf32, #tpu.memory_space<vmem>>, vector<2x1x8x128xf32>,
    %60 = vector.extract_strided_slice %2 {offsets = [3, 0], sizes = [1, 128], strides = [1, 1]} : vector<4x128xf32> to vector<1x128xf32>
    %61 = vector.shape_cast %60 : vector<1x128xf32> to vector<128xf32>
    %62 = vector.extract_strided_slice %3 {offsets = [3, 0], sizes = [1, 128], strides = [1, 1]} : vector<4x128xf32> to vector<1x128xf32>
    %63 = vector.shape_cast %62 : vector<1x128xf32> to vector<128xf32>
    %64 = vector.extract_strided_slice %0 {offsets = [0, 0, 2], sizes = [2, 8, 1], strides = [1, 1, 1]} : vector<2x8x4xf32> to vector<2x8x1xf32>
    %65 = vector.shape_cast %64 : vector<2x8x1xf32> to vector<2x8xf32>
    %66 = vector.shape_cast %65 : vector<2x8xf32> to vector<2x1x8xf32>
    %67 = vector.shape_cast %66 : vector<2x1x8xf32> to vector<2x1x8x1xf32>
    %68 = vector.shape_cast %61 : vector<128xf32> to vector<1x1x1x128xf32>
    %69 = vector.broadcast %67 : vector<2x1x8x1xf32> to vector<2x1x8x128xf32>
    %70 = vector.broadcast %68 : vector<1x1x1x128xf32> to vector<2x1x8x128xf32>
    %71 = arith.mulf %69, %70 : vector<2x1x8x128xf32>
    %72 = vector.shape_cast %63 : vector<128xf32> to vector<1x1x1x128xf32>
    %73 = vector.broadcast %72 : vector<1x1x1x128xf32> to vector<2x1x8x128xf32>
    %74 = arith.addf %71, %73 : vector<2x1x8x128xf32>
    %c0_27 = arith.constant 0 : index
    %c0_28 = arith.constant 0 : index
    %c0_29 = arith.constant 0 : index
    %c0_30 = arith.constant 0 : index
    %75 = vector.load %arg7[%c0_27, %c0_28, %c0_29, %c0_30] : memref<2x2x8x128xf32, #tpu.memory_space<vmem>>, vector<2x1x8x128xf32>
    tpu.vector_store %arg7[%c0_27, %c0_28, %c0_29, %c0_30], %74 {strides = array<i32>} : memref<2x2x8x128xf32, #tpu.memory_space<vmem>>, vector<2x1x8x128xf32>,
    %c0_31 = arith.constant 0 : index
    %c1_32 = arith.constant 1 : index
    %c0_33 = arith.constant 0 : index
    %c0_34 = arith.constant 0 : index
    %76 = vector.load %arg7[%c0_31, %c1_32, %c0_33, %c0_34] : memref<2x2x8x128xf32, #tpu.memory_space<vmem>>, vector<2x1x8x128xf32>
    %77 = vector.shape_cast %76 : vector<2x1x8x128xf32> to vector<2x8x128xf32>
    %78 = vector.shape_cast %14 : vector<2x8x128xf32> to vector<2x1x8x128xf32>
    tpu.vector_store %arg7[%c0_31, %c1_32, %c0_33, %c0_34], %78 {strides = array<i32>} : memref<2x2x8x128xf32, #tpu.memory_space<vmem>>, vector<2x1x8x128xf32>,
    %79 = vector.extract_strided_slice %2 {offsets = [0, 0], sizes = [1, 128], strides = [1, 1]} : vector<4x128xf32> to vector<1x128xf32>
    %80 = vector.shape_cast %79 : vector<1x128xf32> to vector<128xf32>
    %81 = vector.extract_strided_slice %3 {offsets = [0, 0], sizes = [1, 128], strides = [1, 1]} : vector<4x128xf32> to vector<1x128xf32>
    %82 = vector.shape_cast %81 : vector<1x128xf32> to vector<128xf32>
    %83 = vector.extract_strided_slice %0 {offsets = [0, 0, 0], sizes = [2, 1, 1], strides = [1, 1, 1]} : vector<2x8x4xf32> to vector<2x1x1xf32>
    %84 = vector.shape_cast %83 : vector<2x1x1xf32> to vector<2x1xf32>
    %85 = vector.shape_cast %84 : vector<2x1xf32> to vector<2x1x1xf32>
    %86 = vector.shape_cast %80 : vector<128xf32> to vector<1x1x128xf32>
    %87 = vector.broadcast %85 : vector<2x1x1xf32> to vector<2x1x128xf32>
    %88 = vector.broadcast %86 : vector<1x1x128xf32> to vector<2x1x128xf32>
    %89 = arith.mulf %87, %88 : vector<2x1x128xf32>
    %90 = vector.shape_cast %82 : vector<128xf32> to vector<1x1x128xf32>
    %91 = vector.broadcast %90 : vector<1x1x128xf32> to vector<2x1x128xf32>
    %92 = arith.addf %89, %91 : vector<2x1x128xf32>
    %c0_35 = arith.constant 0 : index
    %c0_36 = arith.constant 0 : index
    %c0_37 = arith.constant 0 : index
    %93 = vector.load %arg9[%c0_35, %c0_36, %c0_37] : memref<2x2x128xf32, #tpu.memory_space<vmem>>, vector<2x1x128xf32>
    tpu.vector_store %arg9[%c0_35, %c0_36, %c0_37], %92 {strides = array<i32>} : memref<2x2x128xf32, #tpu.memory_space<vmem>>, vector<2x1x128xf32>,
    %94 = vector.extract_strided_slice %24 {offsets = [0, 0, 0], sizes = [2, 1, 128], strides = [1, 1, 1]} : vector<2x8x128xf32> to vector<2x1x128xf32>
    %95 = vector.shape_cast %94 : vector<2x1x128xf32> to vector<2x128xf32>
    %c0_38 = arith.constant 0 : index
    %c1_39 = arith.constant 1 : index
    %c0_40 = arith.constant 0 : index
    %96 = vector.load %arg9[%c0_38, %c1_39, %c0_40] : memref<2x2x128xf32, #tpu.memory_space<vmem>>, vector<2x1x128xf32>
    %97 = vector.shape_cast %96 : vector<2x1x128xf32> to vector<2x128xf32>
    %98 = vector.shape_cast %95 : vector<2x128xf32> to vector<2x1x128xf32>
    tpu.vector_store %arg9[%c0_38, %c1_39, %c0_40], %98 {strides = array<i32>} : memref<2x2x128xf32, #tpu.memory_space<vmem>>, vector<2x1x128xf32>,
    return
  }
  func.func @transform_0(%arg0: i32) -> (i32, i32, i32) {
    %c0_i32 = arith.constant 0 : i32
    %c0_i32_0 = arith.constant 0 : i32
    %c0_i32_1 = arith.constant 0 : i32
    return %arg0, %c0_i32, %c0_i32_0 : i32, i32, i32
  }
  func.func @transform_1(%arg0: i32) -> (i32, i32, i32) {
    %c0_i32 = arith.constant 0 : i32
    %c0_i32_0 = arith.constant 0 : i32
    %c0_i32_1 = arith.constant 0 : i32
    return %arg0, %c0_i32, %c0_i32_0 : i32, i32, i32
  }
  func.func @transform_2(%arg0: i32) -> (i32, i32) {
    %c0_i32 = arith.constant 0 : i32
    %c0_i32_0 = arith.constant 0 : i32
    %c0_i32_1 = arith.constant 0 : i32
    return %c0_i32, %c0_i32_0 : i32, i32
  }
  func.func @transform_3(%arg0: i32) -> (i32, i32) {
    %c0_i32 = arith.constant 0 : i32
    %c0_i32_0 = arith.constant 0 : i32
    %c0_i32_1 = arith.constant 0 : i32
    return %c0_i32, %c0_i32_0 : i32, i32
  }
  func.func @transform_4(%arg0: i32) -> (i32, i32, i32) {
    %c0_i32 = arith.constant 0 : i32
    %c0_i32_0 = arith.constant 0 : i32
    %c0_i32_1 = arith.constant 0 : i32
    %c0_i32_2 = arith.constant 0 : i32
    return %c0_i32, %c0_i32_0, %c0_i32_1 : i32, i32, i32
  }
  func.func @transform_5(%arg0: i32) -> (i32, i32, i32, i32) {
    %c0_i32 = arith.constant 0 : i32
    %c0_i32_0 = arith.constant 0 : i32
    %c0_i32_1 = arith.constant 0 : i32
    %c0_i32_2 = arith.constant 0 : i32
    return %arg0, %c0_i32, %c0_i32_0, %c0_i32_1 : i32, i32, i32, i32
  }
  func.func @transform_6(%arg0: i32) -> (i32, i32, i32, i32) {
    %c0_i32 = arith.constant 0 : i32
    %c0_i32_0 = arith.constant 0 : i32
    %c0_i32_1 = arith.constant 0 : i32
    %c0_i32_2 = arith.constant 0 : i32
    return %arg0, %c0_i32, %c0_i32_0, %c0_i32_1 : i32, i32, i32, i32
  }
  func.func @transform_7(%arg0: i32) -> (i32, i32, i32, i32) {
    %c0_i32 = arith.constant 0 : i32
    %c0_i32_0 = arith.constant 0 : i32
    %c0_i32_1 = arith.constant 0 : i32
    %c0_i32_2 = arith.constant 0 : i32
    return %arg0, %c0_i32, %c0_i32_0, %c0_i32_1 : i32, i32, i32, i32
  }
  func.func @transform_8(%arg0: i32) -> (i32, i32, i32) {
    %c0_i32 = arith.constant 0 : i32
    %c0_i32_0 = arith.constant 0 : i32
    %c0_i32_1 = arith.constant 0 : i32
    return %arg0, %c0_i32, %c0_i32_0 : i32, i32, i32
  }
}

</mosaic_0001>

<bundles_post_ra>
// kernel: tpu_custom_call.1
= control target key start
LH: loop header
LB: loop body
LE: loop exit
PB: predicated region body
PF: predicated region fallthrough
CT: control target
= control target key end

     0   :  { %s2654_s0 = inlined_call_operand.vmem [shape: f32[8,8,4], index: 0, kind: input, shape index: {}]   ;;  %s2655_s1 = inlined_call_operand.vmem [shape: s32[8,8,2], index: 1, kind: input, shape index: {}]   ;;  %s2656_s2 = inlined_call_operand.vmem [shape: f32[4,128], index: 2, kind: input, shape index: {}]   ;;  %s2657_s3 = inlined_call_operand.vmem [shape: f32[4,128], index: 3, kind: input, shape index: {}]   ;;  %s2658_s4 = inlined_call_operand.vmem [shape: f32[2,12,128], index: 4, kind: input, shape index: {}]   ;;  %s2659_s5 = inlined_call_operand.hbm [shape: f32[8,2,8,128], index: 5, kind: output, shape index: {0}]   ;;  %s2660_s6 = inlined_call_operand.hbm [shape: f32[8,2,8,128], index: 6, kind: output, shape index: {1}]   ;;  %s2661_s7 = inlined_call_operand.hbm [shape: f32[8,1,8,128], index: 7, kind: output, shape index: {2}]   ;;  %s2662_s8 = inlined_call_operand.hbm [shape: f32[8,2,128], index: 8, kind: output, shape index: {3}]  }
   0x1   :  { %2668 = sst [smem:[#allocation16_spill]] %s2654_s0 }
   0x2   :  { %2669 = sst [smem:[#allocation17_spill]] %s2655_s1 }
   0x3   :  { %2670 = sst [smem:[#allocation18_spill]] %s2656_s2 }
   0x4   :  { %2671 = sst [smem:[#allocation19_spill]] %s2657_s3 }
   0x5   :  { %2672 = sst [smem:[#allocation20_spill]] %s2658_s4 }
   0x6   :  { %14 = vsyncpa [#allocation3], 0 }
   0x7   :  { %16 = vsyncpa [#allocation3 + $0x1], 0 }
   0x8   :  { %17 = vsyncpa [#allocation5], 0 }
   0x9   :  { %19 = vsyncpa [#allocation5 + $0x1], 0 }
   0xa   :  { %20 = vsyncpa [#allocation8], 0 }
   0xb   :  { %22 = vsyncpa [#allocation8 + $0x1], 0  ;;  %s2299_s27 = smov 0   ;;  %s2301_s28 = smov 0  }
   0xc   :  { %s2303_s29 = smov 0   ;;  %s2305_s30 = smov 0  }
   0xd LB: > { %2673 = sst [smem:[#allocation12_spill]] %s2231_s28  ;;  %s2320_s9 = sadd.s32 4294967295, %s2239_s30   ;;  %s2239_s30 = sphi %s2305_s30, %s2685_s30   ;;  %s2235_s29 = sphi %s2303_s29, %s2688_s29   ;;  %s2231_s28 = sphi %s2301_s28, %s2687_s28   ;;  %s2227_s27 = sphi %s2299_s27, %s2686_s27  }
   0xe   : > { %2674 = sst [smem:[#allocation13_spill]] %s2235_s29  ;;  %s2663_s10 = sadd.s32 4294967294, %s2239_s30  }
   0xf   : > { %s2324_s11 = sadd.s32 1, %s2239_s30   ;;  %s150_s12 = sadd.s32 1, %s2235_s29 }
  0x10   : > { %2675 = sst [smem:[#allocation14_spill]] %s2324_s11  ;;  %s147_s13 = ssub.s32 %s2239_s30, %s2324_s11 }
  0x11   : > { %p160_p0 = scmp.ne.s32.totalorder %s2235_s29, %s2231_s28  ;;  %p148_p1 = scmp.eq.s32.totalorder %s147_s13, 0 }
  0x12   : > { %p161_p2 = scmp.eq.s32.totalorder %s2320_s9, 3  ;;  %p166_p3 = scmp.ne.s32.totalorder %s2231_s28, %s2227_s27 }
  0x13   : > { %p167_p4 = scmp.eq.s32.totalorder %s2663_s10, 3  ;;  %p1760_p7 = scmp.ge.s32.totalorder %s2239_s30, 1 }
  0x14   : > { %s2337_s14 = scalar_select %p148_p1, %s2235_s29, %s150_s12  }
  0x15   : > { %p2339_p5 = por %p161_p2, %p160_p0  ;;  %p2343_p6 = por %p167_p4, %p166_p3 }
  0x16   : > { %2676 = sst [smem:[#allocation15_spill]] %s2337_s14  ;;  %p290_p8 = scmp.lt.s32.totalorder %s2239_s30, 5 }
  0x18   : > { %p291_p9 = pnand %p1760_p7, %p290_p8 }
  0x19   : > { %s1765_s17 = sshll.u32 (!%p291_p9), %s2320_s9, 1  ;;  %v2241_v0 = vmov (!%p291_p9), 1   ;;  %v2242_v1 = vmov (!%p291_p9), 0   ;;  %s2679_s1 = sld [smem:[#allocation17_spill]] (!%p291_p9)  ;;  %vm389_vm0 = vcmask (!%p291_p9), 1043456   ;;  %v2243_v39 = vmov (!%p291_p9), 2  }
  0x1a   : > { %294 = sbr.rel (%p291_p9) target bundleno = 518 (0x206), region = 40  ;;  %2077 = vset.pattern.permute.xlu1 (!%p291_p9), %v2241_v0  ;;  %2076 = vset.pattern.permute.xlu0 (!%p291_p9), %v2242_v1  ;;  %p345_p10 = scmp.lt.s32.totalorder (!%p291_p9), %s1765_s17, 7  ;;  %v2244_v41 = vmov (!%p291_p9), 3   ;;  %v366_v42 = vlaneseq (!%p291_p9)  ;;  %vm382_vm1 = vcmask (!%p291_p9), 97280   ;;  %v2245_v46 = vmov (!%p291_p9), 0.0  }
  0x1b   : > { %s2680_s4 = sld [smem:[#allocation20_spill]] (!%p291_p9)  ;;  %s2681_s0 = sld [smem:[#allocation16_spill]] (!%p291_p9) }
  0x1c   : > { %v367_v43 = vand.u32 (!%p291_p9), 127, %v366_v42  ;;  %s2682_s2 = sld [smem:[#allocation18_spill]] (!%p291_p9)  ;;  %s2683_s3 = sld [smem:[#allocation19_spill]] (!%p291_p9) }
  0x1d   : > { %s2466_s25 = sand.u32 (!%p291_p9), 1, %s2231_s28   ;;  %s1812_s10 = sshll.u32 (!%p291_p9), %s2320_s9, 6 }
  0x1e   : > { %s1761_s26 = sshll.u32 (!%p291_p9), %s2466_s25, 5  ;;  %s1763_s12 = sshll.u32 (!%p291_p9), %s2466_s25, 4 }
  0x1f   : > { %s2476_s13 = scalar_lea.vmem (!%p291_p9), [#allocation4], %s1761_s26  ;;  %s336_s19 = scalar_lea.vmem (!%p291_p9), [#allocation6], %s1763_s12 }
  0x20   : > { %s1764_s20 = sshll.u32 (!%p291_p9), %s2466_s25, 2  ;;  %s1808_s12 = sshll.u32 (!%p291_p9), %s2320_s9, 9 }
  0x21   : > { %s2690_s17 = smov (!%p345_p10, %s1765_s17), 7  ;;  %v381_v4 = vld [vmem:[%s2680_s4 + $0x8] sm:$0xf]  ;;  %v1780_v5 = vld [vmem:[%s2680_s4 + $0x18] sm:$0xf]  ;;  %v380_v6 = vld [vmem:[%s2680_s4] sm:$0xff]  ;;  %s2527_s28 = scalar_lea.hbm %s2662_s8, %s1812_s10 }
  0x22   : > { %s1766_s18 = sshll.u32 %s2690_s17, 3  ;;  %v391_v7 = vsel %vm389_vm0, %v381_v4, 0  ;;  %v1779_v8 = vld [vmem:[%s2680_s4 + $0x10] sm:$0xff]  ;;  %v917_v9 = vsel %vm389_vm0, %v1780_v5, 0  ;;  %v394_v10 = vand.u32 4294901760, %v380_v6  ;;  %s1558_s17 = sshll.u32 %s2476_s13, 4  ;;  %s2495_s17 = int_to_ptr.vmem [resolvable:$true] %s1558_s17 }
  0x23   : > { %s354_s21 = scalar_lea.vmem %s2679_s1, %s1766_s18  ;;  %v397_v11 = vand.u32 4294901760, %v391_v7  ;;  %v920_v12 = vand.u32 4294901760, %v1779_v8  ;;  %v923_v13 = vand.u32 4294901760, %v917_v9  ;;  %s348_s22 = scalar_lea.vmem %s2681_s0, %s1766_s18 }
  0x24   : > { %v362_v2 = vld [vmem:[%s354_s21] sm:$0xff]  ;;  %v363_v3 = vld [vmem:[%s354_s21 + $0x8] sm:$0xff]  ;;  %v482_v16 = vsub.f32 %v380_v6, %v394_v10  ;;  %s2483_s21 = scalar_lea.vmem [#allocation2], %s1761_s26  ;;  %s1574_s18 = sshll.u32 %s336_s19, 4  ;;  %s2497_s18 = int_to_ptr.vmem [resolvable:$true] %s1574_s18 }
  0x25   : > { %896 = vperm.xlu1 %2077, %v362_v2   ;;  %369 = vperm.xlu0 %2076, %v362_v2   ;;  %v2372_v14 = vpack.c.bf16 %v397_v11, %v394_v10  ;;  %v2374_v15 = vpack.c.bf16 %v923_v13, %v920_v12  ;;  %v489_v17 = vsub.f32 %v391_v7, %v397_v11  ;;  %v361_v38 = vld [vmem:[%s348_s22 + $0x8] sm:$0xff]  ;;  %v360_v40 = vld [vmem:[%s348_s22] sm:$0xff]  ;;  %s2486_s22 = scalar_lea.vmem [#allocation7], %s1764_s20  ;;  %s1541_s23 = sshll.u32 %s2483_s21, 4  ;;  %s2499_s23 = int_to_ptr.vmem [resolvable:$true] %s1541_s23 }
  0x26   : > { %v1008_v18 = vsub.f32 %v1779_v8, %v920_v12  ;;  %v1015_v19 = vsub.f32 %v917_v9, %v923_v13  ;;  %v483_v20 = vand.u32 4294901760, %v482_v16  ;;  %v1432_v9 = vshrl.u32 %v366_v42, 7  ;;  %v364_v11 = vld [vmem:[%s2682_s2] sm:$0xf]  ;;  %s1590_s24 = sshll.u32 %s2486_s22, 4  ;;  %s1516_s26 = sand.u32 1, %s2320_s9   ;;  %s2501_s24 = int_to_ptr.vmem [resolvable:$true] %s1590_s24 }
  0x27   : > { %1946 = vmatprep.subr.bf16.mxu0 %v2372_v14  ;;  %1970 = vmatprep.subr.bf16.mxu1 %v2374_v15  ;;  %v490_v21 = vand.u32 4294901760, %v489_v17  ;;  %v2382_v33 = vpack.c.bf16 %v489_v17, %v482_v16  ;;  %v365_v12 = vld [vmem:[%s2683_s3] sm:$0xf]  ;;  %s1811_s20 = sshll.u32 %s2320_s9, 8  ;;  %s2509_s1 = scalar_lea.hbm %s2660_s6, %s1808_s12 }
  0x28   : > { %1948 = vmatpush3.bf16.msra.mxu0 %v2372_v14  ;;  %1972 = vmatpush3.bf16.msra.mxu1 %v2374_v15  ;;  %v1009_v22 = vand.u32 4294901760, %v1008_v18  ;;  %v1016_v23 = vand.u32 4294901760, %v1015_v19  ;;  %v484_v24 = vsub.f32 %v482_v16, %v483_v20  ;;  %v2388_v35 = vpack.c.bf16 %v1015_v19, %v1008_v18  ;;  %s2514_s4 = scalar_lea.hbm %s2659_s5, %s1808_s12  ;;  %s2532_s2 = scalar_lea.sflag [#allocation5], %s1516_s26 }
  0x29   : > { %899 = vperm.xlu1 %2077, %v363_v3   ;;  %372 = vperm.xlu0 %2076, %v363_v3   ;;  %v491_v25 = vsub.f32 %v489_v17, %v490_v21  ;;  %v2390_v36 = vpack.c.bf16 %v490_v21, %v483_v20  ;;  %v1480_v10 = vsub.s32 3, %v1432_v9  ;;  %s2085_s3 = scalar_lea.vmem %s2495_s17, 512  ;;  %s2246_s12 = smov [#allocation4]  }
  0x2a   : > { %v1010_v26 = vsub.f32 %v1008_v18, %v1009_v22  ;;  %v1017_v27 = vsub.f32 %v1015_v19, %v1016_v23  ;;  %v485_v28 = vand.u32 4294901760, %v484_v24  ;;  %v2392_v37 = vpack.c.bf16 %v1016_v23, %v1009_v22  ;;  %p2086_p11 = scmp.ne.s32.totalorder %s2495_s17, %s2085_s3  ;;  %s2089_s11 = sshll.u32 %s2246_s12, 4  ;;  %s2090_s11 = int_to_ptr.vmem [resolvable:$false] %s2089_s11 }
  0x2b   : > { %v492_v29 = vand.u32 4294901760, %v491_v25  ;;  %v1481_v13 = vrot.slane %v364_v11, %v1480_v10  ;;  %v1455_v22 = vsub.s32 2, %v1432_v9  ;;  %p2092_p0 = scmp.lt.s32.totalorder %s2495_s17, %s2090_s11 }
  0x2c   : > { %v1011_v30 = vand.u32 4294901760, %v1010_v26  ;;  %v1018_v31 = vand.u32 4294901760, %v1017_v27  ;;  %p2087_p12 = pnand %p2086_p11, %p2339_p5 }
  0x2d   : > { %v2380_v32 = vpack.c.bf16 %v492_v29, %v485_v28  ;;  %2079 = vset.pattern.permute.xlu1 %v2243_v39  ;;  %2078 = vset.pattern.permute.xlu0 %v2243_v39  ;;  %v1456_v29 = vrot.slane %v364_v11, %v1455_v22 }
  0x2e   : > { %v2384_v34 = vpack.c.bf16 %v1018_v31, %v1011_v30  ;;  %1475 = vperm.xlu1 %2079, %v361_v38   ;;  %1471 = vperm.xlu0 %2078, %v360_v40   ;;  %p2088_p13 = pneg %p2087_p12 }
  0x2f   : > { %1950 = vmatprep.subr.bf16.mxu0 %v2380_v32 }
  0x30   : > { %1974 = vmatprep.subr.bf16.mxu1 %v2384_v34 }
  0x32   : > { %2080 = vset.pattern.permute.xlu1 %v2241_v0  ;;  %2081 = vset.pattern.permute.xlu0 %v2241_v0 }
  0x33   : > { %1423 = vperm.xlu1 %2080, %v360_v40   ;;  %1428 = vperm.xlu0 %2081, %v361_v38  }
  0x37   : > { %2082 = vset.pattern.permute.xlu1 %v2244_v41  ;;  %2083 = vset.pattern.permute.xlu0 %v2242_v1 }
  0x38   : > { %1446 = vperm.xlu1 %2082, %v360_v40   ;;  %1496 = vperm.xlu0 %2083, %v360_v40  }
  0x3c   : > { %1450 = vperm.xlu1 %2082, %v361_v38  }
  0x40   : > { %2084 = vset.pattern.permute.xlu1 %v2242_v1 }
  0x41   : > { %1500 = vperm.xlu1 %2084, %v361_v38  }
  0xa4   : > { %v897_v44 = vpop.permute.xlu1 %896  ;;  %v370_v45 = vpop.permute.xlu0 %369 }
  0xa5   : > { %vm901_vm2 = vcmp.eq.s32.totalorder %v897_v44, %v367_v43  ;;  %vm374_vm3 = vcmp.eq.s32.totalorder %v370_v45, %v367_v43 }
  0xa6   : > { %v2404_v47 = vsel %vm901_vm2, 1.0, %v2245_v46  ;;  %v2406_v48 = vsel %vm374_vm3, 1.0, %v2245_v46 }
  0xa7   : > { %v384_v49 = vsel %vm382_vm1, %v2406_v48, 0  ;;  %v911_v50 = vsel %vm382_vm1, %v2404_v47, 0 }
  0xa8   : > { %v900_v51 = vpop.permute.xlu1 %899  ;;  %v373_v52 = vpop.permute.xlu0 %372  ;;  %v461_v53 = vsub.f32 %v384_v49, %v384_v49  ;;  %v987_v54 = vsub.f32 %v911_v50, %v911_v50 }
  0xa9   : > { %vm902_vm4 = vcmp.eq.s32.totalorder %v900_v51, %v367_v43  ;;  %vm375_vm5 = vcmp.eq.s32.totalorder %v373_v52, %v367_v43 }
  0xaa   : > { %v2412_v55 = vsel %vm902_vm4, 1.0, %v2245_v46  ;;  %v2414_v56 = vsel %vm375_vm5, 1.0, %v2245_v46  ;;  %v462_v57 = vand.u32 4294901760, %v461_v53  ;;  %v988_v58 = vand.u32 4294901760, %v987_v54 }
  0xab   : > { %v914_v59 = vsel %vm382_vm1, %v2412_v55, 0  ;;  %v387_v60 = vsel %vm382_vm1, %v2414_v56, 0 }
  0xac   : > { %v997_v61 = vsub.f32 %v914_v59, %v914_v59  ;;  %v471_v62 = vsub.f32 %v387_v60, %v387_v60  ;;  %v463_v63 = vsub.f32 %v461_v53, %v462_v57  ;;  %v989_v0 = vsub.f32 %v987_v54, %v988_v58 }
  0xad   : > { %v1476_v16 = vpop.permute.xlu1 %1475  ;;  %v1472_v17 = vpop.permute.xlu0 %1471 }
  0xae   : > { %v464_v1 = vand.u32 4294901760, %v463_v63  ;;  %v990_v2 = vand.u32 4294901760, %v989_v0  ;;  %v472_v3 = vand.u32 4294901760, %v471_v62  ;;  %v998_v4 = vand.u32 4294901760, %v997_v61 }
  0xaf   : > { %v1483_v18 = vmul.f32 %v1481_v13, %v1476_v16  ;;  %v1482_v19 = vmul.f32 %v1481_v13, %v1472_v17 }
  0xb0   : > { %1865 = vmatprep.mubr.f32.mxu0 %v464_v1  ;;  %1907 = vmatprep.mubr.f32.mxu1 %v990_v2  ;;  %v473_v5 = vsub.f32 %v471_v62, %v472_v3  ;;  %v999_v6 = vsub.f32 %v997_v61, %v998_v4 }
  0xb2   : > { %v474_v7 = vand.u32 4294901760, %v473_v5  ;;  %v1000_v8 = vand.u32 4294901760, %v999_v6  ;;  %v1424_v25 = vpop.permute.xlu1 %1423  ;;  %v1429_v26 = vpop.permute.xlu0 %1428 }
  0xb4   : > { %1866 = vmatmul.mubr.f32.vlgmr.msra.gmra.mrb[0].mxu0 %v474_v7  ;;  %1908 = vmatmul.mubr.f32.vlgmr.msra.gmra.mrb[0].mxu1 %v1000_v8 }
  0xb5   : > { %1952 = vmatpush3.bf16.msra.mxu0 %v2380_v32  ;;  %1872 = vmatprep.mubr.msk.f32.mxu0 %vm382_vm1, %v2406_v48  ;;  %v1462_v32 = vrot.slane %v365_v12, %v1455_v22 }
  0xb6   : > { %1976 = vmatpush3.bf16.msra.mxu1 %v2384_v34  ;;  %1914 = vmatprep.mubr.msk.f32.mxu1 %vm382_vm1, %v2404_v47 }
  0xb7   : > { %1954 = vmatprep.subr.bf16.mxu0 %v2382_v33  ;;  %1978 = vmatprep.subr.bf16.mxu1 %v2388_v35  ;;  %v1497_v34 = vpop.permute.xlu0 %1496 }
  0xbc   : > { %1873 = vmatmul.mubr.msk.f32.vlgmr.msra.gmra.mrb[0].mxu0 %vm382_vm1, %v2414_v56  ;;  %1915 = vmatmul.mubr.msk.f32.vlgmr.msra.gmra.mrb[0].mxu1 %vm382_vm1, %v2412_v55 }
  0xbd   : > { %1956 = vmatpush3.bf16.msra.mxu0 %v2382_v33  ;;  %1879 = vmatprep.mubr.f32.mxu0 %v461_v53  ;;  %v1447_v33 = vpop.permute.xlu1 %1446 }
  0xbe   : > { %1980 = vmatpush3.bf16.msra.mxu1 %v2388_v35  ;;  %1921 = vmatprep.mubr.f32.mxu1 %v987_v54  ;;  %v1457_v35 = vmul.f32 %v1456_v29, %v1447_v33 }
  0xbf   : > { %1958 = vmatprep.subr.bf16.mxu0 %v2372_v14  ;;  %1982 = vmatprep.subr.bf16.mxu1 %v2374_v15 }
  0xc1   : > { %v1451_v39 = vpop.permute.xlu1 %1450 }
  0xc2   : > { %v1458_v40 = vmul.f32 %v1456_v29, %v1451_v39 }
  0xc4   : > { %1880 = vmatmul.mubr.f32.vlgmr.msra.gmra.mrb[0].mxu0 %v471_v62  ;;  %1922 = vmatmul.mubr.f32.vlgmr.msra.gmra.mrb[0].mxu1 %v997_v61  ;;  %v1464_v41 = vadd.f32 %v1462_v32, %v1458_v40 }
  0xc5   : > { %1960 = vmatpush3.bf16.msra.mxu0 %v2372_v14  ;;  %1886 = vmatprep.mubr.f32.mxu0 %v462_v57  ;;  %v1501_v42 = vpop.permute.xlu1 %1500 }
  0xc6   : > { %1984 = vmatpush3.bf16.msra.mxu1 %v2374_v15  ;;  %1928 = vmatprep.mubr.f32.mxu1 %v988_v58  ;;  %1466 = vst [vmem:[%s2483_s21 + $0x10] sm:$0xff] %v1464_v41  ;;  %v1504_v43 = vmul.f32 %v1501_v42, %v364_v11 }
  0xc7   : > { %1962 = vmatprep.subr.bf16.mxu0 %v2390_v36  ;;  %1986 = vmatprep.subr.bf16.mxu1 %v2392_v37 }
  0xc8   : > { %v1506_v44 = vadd.f32 %v1504_v43, %v365_v12 }
  0xca   : > { %1508 = vst [vmem:[%s2486_s22 + $0x2] sm:$0x1] %v1506_v44 }
  0xcc   : > { %1887 = vmatmul.mubr.f32.vlgmr.msra.gmra.mrb[0].mxu0 %v472_v3  ;;  %1929 = vmatmul.mubr.f32.vlgmr.msra.gmra.mrb[0].mxu1 %v998_v4 }
  0xcd   : > { %1964 = vmatpush3.bf16.msra.mxu0 %v2390_v36  ;;  %1893 = vmatprep.mubr.msk.f32.mxu0 %vm382_vm1, %v2406_v48  ;;  %v1503_v36 = vmul.f32 %v1497_v34, %v364_v11 }
  0xce   : > { %1988 = vmatpush3.bf16.msra.mxu1 %v2392_v37  ;;  %1935 = vmatprep.mubr.msk.f32.mxu1 %vm382_vm1, %v2404_v47  ;;  %v1463_v37 = vadd.f32 %v1462_v32, %v1457_v35 }
  0xcf   : > { %1966 = vmatprep.subr.bf16.mxu0 %v2372_v14  ;;  %1990 = vmatprep.subr.bf16.mxu1 %v2374_v15  ;;  %v1505_v38 = vadd.f32 %v1503_v36, %v365_v12 }
  0xd0   : > { %1465 = vst [vmem:[%s2483_s21] sm:$0xff] %v1463_v37 }
  0xd1   : > { %1507 = vst [vmem:[%s2486_s22] sm:$0x1] %v1505_v38 }
  0xd4   : > { %1894 = vmatmul.mubr.msk.f32.vlgmr.msra.gmra.mrb[0].mxu0 %vm382_vm1, %v2414_v56  ;;  %1936 = vmatmul.mubr.msk.f32.vlgmr.msra.gmra.mrb[0].mxu1 %vm382_vm1, %v2412_v55 }
  0xd5   : > { %1968 = vmatpush3.bf16.msra.mxu0 %v2372_v14  ;;  %1900 = vmatprep.mubr.msk.f32.mxu0 %vm382_vm1, %v2406_v48  ;;  %v1433_v14 = vsub.s32 1, %v1432_v9 }
  0xd6   : > { %1992 = vmatpush3.bf16.msra.mxu1 %v2374_v15  ;;  %1942 = vmatprep.mubr.msk.f32.mxu1 %vm382_vm1, %v2404_v47  ;;  %v1487_v15 = vrot.slane %v365_v12, %v1480_v10 }
  0xd7   : > { %v1434_v20 = vrot.slane %v364_v11, %v1433_v14  ;;  %v1440_v24 = vrot.slane %v365_v12, %v1433_v14 }
  0xd8   : > { %v1489_v21 = vadd.f32 %v1487_v15, %v1483_v18  ;;  %v1488_v23 = vadd.f32 %v1487_v15, %v1482_v19 }
  0xd9   : > { %v1435_v27 = vmul.f32 %v1434_v20, %v1424_v25  ;;  %v1436_v28 = vmul.f32 %v1434_v20, %v1429_v26 }
  0xda   : > { %1491 = vst [vmem:[%s2476_s13 + $0x10] sm:$0xff] %v1489_v21  ;;  %1490 = vst [vmem:[%s2476_s13] sm:$0xff] %v1488_v23 }
  0xdb   : > { %v1441_v30 = vadd.f32 %v1440_v24, %v1435_v27  ;;  %v1442_v31 = vadd.f32 %v1440_v24, %v1436_v28 }
  0xdc   : > { %1901 = vmatmul.mubr.msk.f32.vlgmr.msra.gmra.mrb[0].mxu0 %vm382_vm1, %v2414_v56  ;;  %1943 = vmatmul.mubr.msk.f32.vlgmr.msra.gmra.mrb[0].mxu1 %vm382_vm1, %v2412_v55 }
  0xdd   : > { %1443 = vst [vmem:[%s336_s19] sm:$0xff] %v1441_v30  ;;  %1444 = vst [vmem:[%s336_s19 + $0x8] sm:$0xff] %v1442_v31  ;;  %s2522_s19 = scalar_lea.hbm %s2661_s7, %s1811_s20  ;;  %s2091_s20 = scalar_lea.vmem %s2090_s11, 1024 }
  0xde   : > { %p2093_p1 = scmp.lt.s32.totalorder %s2091_s20, %s2085_s3 }
  0xe0   : > { %p2094_p2 = por %p2093_p1, %p2092_p0 }
  0xe2   : > { %p2095_p3 = pnand %p2094_p2, %p2088_p13 }
 0x1af   : > { %v1902_v45 = vpop.f32.mrb[0].mxu0  ;;  %v1944_v46 = vpop.f32.mrb[0].mxu1 }
 0x1b0   : > { %1790 = vst [vmem:[%s2476_s13 + $0x18] sm:$0xff] %v1902_v45  ;;  %1788 = vst [vmem:[%s2483_s21 + $0x18] sm:$0xff] %v1944_v46  ;;  %v885_v47 = vpop.f32.mrb[1].mxu0  ;;  %v1411_v48 = vpop.f32.mrb[1].mxu1 }
 0x1b1   : > { %1510 = vst [vmem:[%s2486_s22 + $0x3] sm:$0x1] %v1944_v46  ;;  %1789 = vst [vmem:[%s2476_s13 + $0x8] sm:$0xff] %v885_v47 }
 0x1b2   : > { %1787 = vst [vmem:[%s2483_s21 + $0x8] sm:$0xff] %v1411_v48  ;;  %1509 = vst [vmem:[%s2486_s22 + $0x1] sm:$0x1] %v1411_v48 }
 0x1b3   : > { %2098 = shalt.err (!%p2095_p3)
}
 0x1b4   : > { %s2099_s29 = scalar_lea.hbm %s2509_s1, 512  ;;  %s2103_s13 = scalar_lea.hbm %s2660_s6, 2048 }
 0x1b5   : > { %p2100_p4 = scmp.ne.s32.totalorder %s2509_s1, %s2099_s29  ;;  %p2104_p9 = scmp.lt.u32.totalorder %s2509_s1, %s2660_s6 }
 0x1b6   : > { %p2105_p10 = scmp.lt.u32.totalorder %s2103_s13, %s2099_s29  ;;  %p2107_p12 = scmp.lt.u32.totalorder %s2099_s29, %s2509_s1 }
 0x1b7   : > { %p2101_p7 = pnand %p2100_p4, %p2339_p5 }
 0x1b8   : > { %p2106_p11 = por %p2105_p10, %p2104_p9 }
 0x1b9   : > { %p2102_p8 = pneg %p2101_p7 }
 0x1ba   : > { %p2108_p13 = por %p2107_p12, %p2106_p11 }
 0x1bc   : > { %p2109_p0 = pnand %p2108_p13, %p2102_p8 }
 0x1be   : > { %2112 = shalt.err (!%p2109_p0)
}
 0x1bf   : > { %s2247_s22 = smov 128   ;;  %s2248_s26 = smov 8  }
 0x1c0   : > { %2014 = dma.vmem_to_hbm [thread:$0]  (%p2339_p5), %s2495_s17, 512, %s2509_s1, %s2532_s2, %s2247_s22, %s2247_s22, %s2248_s26  }
 0x1c1   : > { %s1512_s9 = scalar_lea.sflag [#allocation3], %s2466_s25  ;;  %s2113_s0 = scalar_lea.vmem %s2499_s23, 512 }
 0x1c2   : > { %p2114_p1 = scmp.ne.s32.totalorder %s2499_s23, %s2113_s0  ;;  %s2249_s3 = smov [#allocation2]  }
 0x1c3   : > { %s2117_s12 = sshll.u32 %s2249_s3, 4  ;;  %s2118_s12 = int_to_ptr.vmem [resolvable:$false] %s2117_s12 }
 0x1c4   : > { %p2115_p2 = pnand %p2114_p1, %p2339_p5  ;;  %s2119_s20 = scalar_lea.vmem %s2118_s12, 1024 }
 0x1c5   : > { %p2120_p4 = scmp.lt.s32.totalorder %s2499_s23, %s2118_s12  ;;  %p2121_p7 = scmp.lt.s32.totalorder %s2119_s20, %s2113_s0 }
 0x1c6   : > { %p2116_p3 = pneg %p2115_p2 }
 0x1c7   : > { %p2122_p8 = por %p2121_p7, %p2120_p4 }
 0x1c9   : > { %p2123_p9 = pnand %p2122_p8, %p2116_p3 }
 0x1cb   : > { %2126 = shalt.err (!%p2123_p9)
}
 0x1cc   : > { %s2127_s1 = scalar_lea.hbm %s2514_s4, 512  ;;  %s2131_s10 = scalar_lea.hbm %s2659_s5, 2048 }
 0x1cd   : > { %p2128_p10 = scmp.ne.s32.totalorder %s2514_s4, %s2127_s1  ;;  %p2132_p13 = scmp.lt.u32.totalorder %s2514_s4, %s2659_s5 }
 0x1ce   : > { %p2133_p0 = scmp.lt.u32.totalorder %s2131_s10, %s2127_s1  ;;  %p2135_p2 = scmp.lt.u32.totalorder %s2127_s1, %s2514_s4 }
 0x1cf   : > { %p2129_p11 = pnand %p2128_p10, %p2339_p5 }
 0x1d0   : > { %p2134_p1 = por %p2133_p0, %p2132_p13 }
 0x1d1   : > { %p2130_p12 = pneg %p2129_p11 }
 0x1d2   : > { %p2136_p3 = por %p2135_p2, %p2134_p1 }
 0x1d4   : > { %p2137_p4 = pnand %p2136_p3, %p2130_p12 }
 0x1d6   : > { %2140 = shalt.err (!%p2137_p4)
}
 0x1d7   : > { %2013 = dma.vmem_to_hbm [thread:$0]  (%p2339_p5), %s2499_s23, 512, %s2514_s4, %s1512_s9, %s2247_s22, %s2247_s22, %s2248_s26  }
 0x1d8   : > { %s2141_s21 = scalar_lea.vmem %s2497_s18, 256  ;;  %s2250_s11 = smov [#allocation6]  }
 0x1d9   : > { %p2142_p7 = scmp.ne.s32.totalorder %s2497_s18, %s2141_s21  ;;  %s2145_s0 = sshll.u32 %s2250_s11, 4  ;;  %s2146_s0 = int_to_ptr.vmem [resolvable:$false] %s2145_s0 }
 0x1da   : > { %s2147_s3 = scalar_lea.vmem %s2146_s0, 512  ;;  %p2148_p10 = scmp.lt.s32.totalorder %s2497_s18, %s2146_s0 }
 0x1db   : > { %p2143_p8 = pnand %p2142_p7, %p2339_p5  ;;  %p2149_p11 = scmp.lt.s32.totalorder %s2147_s3, %s2141_s21 }
 0x1dd   : > { %p2144_p9 = pneg %p2143_p8  ;;  %p2150_p12 = por %p2149_p11, %p2148_p10 }
 0x1df   : > { %p2151_p13 = pnand %p2150_p12, %p2144_p9 }
 0x1e1   : > { %2154 = shalt.err (!%p2151_p13)
}
 0x1e2   : > { %s2155_s4 = scalar_lea.hbm %s2522_s19, 256  ;;  %s2159_s12 = scalar_lea.hbm %s2661_s7, 1024 }
 0x1e3   : > { %p2156_p0 = scmp.ne.s32.totalorder %s2522_s19, %s2155_s4  ;;  %p2160_p3 = scmp.lt.u32.totalorder %s2522_s19, %s2661_s7 }
 0x1e4   : > { %p2161_p4 = scmp.lt.u32.totalorder %s2159_s12, %s2155_s4  ;;  %p2163_p8 = scmp.lt.u32.totalorder %s2155_s4, %s2522_s19 }
 0x1e5   : > { %p2157_p1 = pnand %p2156_p0, %p2339_p5 }
 0x1e6   : > { %p2162_p7 = por %p2161_p4, %p2160_p3 }
 0x1e7   : > { %p2158_p2 = pneg %p2157_p1 }
 0x1e8   : > { %p2164_p9 = por %p2163_p8, %p2162_p7 }
 0x1ea   : > { %p2165_p10 = pnand %p2164_p9, %p2158_p2 }
 0x1ec   : > { %2168 = shalt.err (!%p2165_p10)
}
 0x1ed   : > { %2015 = dma.vmem_to_hbm [thread:$0]  (%p2339_p5), %s2497_s18, 256, %s2522_s19, %s2532_s2, %s2247_s22, %s2247_s22, %s2248_s26  }
 0x1ee   : > { %s1527_s17 = scalar_lea.sflag [#allocation8], %s2466_s25  ;;  %s2169_s29 = scalar_lea.vmem %s2501_s24, 64 }
 0x1ef   : > { %p2170_p11 = scmp.ne.s32.totalorder %s2501_s24, %s2169_s29  ;;  %s2251_s10 = smov [#allocation7]  }
 0x1f0   : > { %s2173_s14 = sshll.u32 %s2251_s10, 4  ;;  %s2174_s14 = int_to_ptr.vmem [resolvable:$false] %s2173_s14 }
 0x1f1   : > { %p2171_p12 = pnand %p2170_p11, %p2339_p5  ;;  %s2175_s13 = scalar_lea.vmem %s2174_s14, 128 }
 0x1f2   : > { %p2176_p0 = scmp.lt.s32.totalorder %s2501_s24, %s2174_s14  ;;  %p2177_p1 = scmp.lt.s32.totalorder %s2175_s13, %s2169_s29 }
 0x1f3   : > { %p2172_p13 = pneg %p2171_p12 }
 0x1f4   : > { %p2178_p2 = por %p2177_p1, %p2176_p0 }
 0x1f6   : > { %p2179_p3 = pnand %p2178_p2, %p2172_p13 }
 0x1f8   : > { %2182 = shalt.err (!%p2179_p3)
}
 0x1f9   : > { %s2183_s18 = scalar_lea.hbm %s2527_s28, 64  ;;  %s2187_s22 = scalar_lea.hbm %s2662_s8, 256 }
 0x1fa   : > { %p2184_p4 = scmp.ne.s32.totalorder %s2527_s28, %s2183_s18  ;;  %p2188_p9 = scmp.lt.u32.totalorder %s2527_s28, %s2662_s8 }
 0x1fb   : > { %p2189_p10 = scmp.lt.u32.totalorder %s2187_s22, %s2183_s18  ;;  %p2191_p12 = scmp.lt.u32.totalorder %s2183_s18, %s2527_s28 }
 0x1fc   : > { %p2185_p7 = pnand %p2184_p4, %p2339_p5 }
 0x1fd   : > { %p2190_p11 = por %p2189_p10, %p2188_p9 }
 0x1fe   : > { %p2186_p8 = pneg %p2185_p7 }
 0x1ff   : > { %p2192_p13 = por %p2191_p12, %p2190_p11 }
 0x201   : > { %p2193_p0 = pnand %p2192_p13, %p2186_p8 }
 0x203   : > { %2196 = shalt.err (!%p2193_p0)
}
 0x204   : > { %s2252_s11 = smov 32   ;;  %s2253_s0 = smov 2  }
 0x205   : > { %2016 = dma.vmem_to_hbm [thread:$0]  (%p2339_p5), %s2501_s24, 64, %s2527_s28, %s1527_s17, %s2252_s11, %s2252_s11, %s2253_s0  }
 0x206 PF: > { %p2034_p1 = scmp.ge.s32.totalorder %s2239_s30, 2  ;;  %s1605_s3 = sand.u32 1, %s2227_s27  }
 0x207   : > { %s1606_s4 = scalar_lea.sflag [#allocation3], %s1605_s3 }
 0x208   : > { %p2022_p2 = pnand %p2034_p1, %p2343_p6 }
 0x20a   : > { %2214 = dma.done.wait (!%p2022_p2), %s1606_s4, 512  }
 0x20b   : > { %2216 = vsyncadd (!%p2022_p2), %s1606_s4, 4294966784  ;;  %s2684_s23 = sadd.s32 4294967294, %s2239_s30  }
 0x20c   : > { %s1614_s9 = sand.u32 1, %s2684_s23  }
 0x20d   : > { %s1615_s12 = scalar_lea.sflag [#allocation5], %s1614_s9 }
 0x20e   : > { %2218 = dma.done.wait (!%p2022_p2), %s1615_s12, 768  }
 0x20f   : > { %2220 = vsyncadd (!%p2022_p2), %s1615_s12, 4294966528  ;;  %s1633_s15 = scalar_lea.sflag [#allocation8], %s1605_s3 }
 0x210   : > { %2222 = dma.done.wait (!%p2022_p2), %s1633_s15, 64  }
 0x211   : > { %2224 = vsyncadd (!%p2022_p2), %s1633_s15, 4294967232  ;;  %s2685_s30 = sld [smem:[#allocation14_spill]]  ;;  %s2686_s27 = sld [smem:[#allocation12_spill]] }
 0x212   : > { %s2687_s28 = sld [smem:[#allocation13_spill]]  ;;  %s2688_s29 = sld [smem:[#allocation15_spill]] }
 0x217   : > { %p25_p5 = scmp.ge.s32.totalorder %s2685_s30, 6  }
 0x219   :  { %27 = sbr.rel (!%p25_p5) target bundleno = 13 (0xd), region = 130 }
 0x220   :  { %1638 = vsyncpa [#allocation3], 1 }
 0x221   :  { %1640 = vsyncpa [#allocation3 + $0x1], 1 }
 0x222   :  { %1641 = vsyncpa [#allocation5], 1 }
 0x223   :  { %1643 = vsyncpa [#allocation5 + $0x1], 1 }
 0x224   :  { %1644 = vsyncpa [#allocation8], 1 }
 0x225   :  { %1646 = vsyncpa [#allocation8 + $0x1], 1 }

// kernel: tpu_custom_call.1
= control target key start
LH: loop header
LB: loop body
LE: loop exit
PB: predicated region body
PF: predicated region fallthrough
CT: control target
= control target key end

     0   :  { %s2654_s0 = inlined_call_operand.vmem [shape: f32[8,8,4], index: 0, kind: input, shape index: {}]   ;;  %s2655_s1 = inlined_call_operand.vmem [shape: s32[8,8,2], index: 1, kind: input, shape index: {}]   ;;  %s2656_s2 = inlined_call_operand.vmem [shape: f32[4,128], index: 2, kind: input, shape index: {}]   ;;  %s2657_s3 = inlined_call_operand.vmem [shape: f32[4,128], index: 3, kind: input, shape index: {}]   ;;  %s2658_s4 = inlined_call_operand.vmem [shape: f32[2,12,128], index: 4, kind: input, shape index: {}]   ;;  %s2659_s5 = inlined_call_operand.hbm [shape: f32[8,2,8,128], index: 5, kind: output, shape index: {0}]   ;;  %s2660_s6 = inlined_call_operand.hbm [shape: f32[8,2,8,128], index: 6, kind: output, shape index: {1}]   ;;  %s2661_s7 = inlined_call_operand.hbm [shape: f32[8,1,8,128], index: 7, kind: output, shape index: {2}]   ;;  %s2662_s8 = inlined_call_operand.hbm [shape: f32[8,2,128], index: 8, kind: output, shape index: {3}]  }
   0x1   :  { %2668 = sst [smem:[#allocation16_spill]] %s2654_s0 }
   0x2   :  { %2669 = sst [smem:[#allocation17_spill]] %s2655_s1 }
   0x3   :  { %2670 = sst [smem:[#allocation18_spill]] %s2656_s2 }
   0x4   :  { %2671 = sst [smem:[#allocation19_spill]] %s2657_s3 }
   0x5   :  { %2672 = sst [smem:[#allocation20_spill]] %s2658_s4 }
   0x6   :  { %14 = vsyncpa [#allocation3], 0 }
   0x7   :  { %16 = vsyncpa [#allocation3 + $0x1], 0 }
   0x8   :  { %17 = vsyncpa [#allocation5], 0 }
   0x9   :  { %19 = vsyncpa [#allocation5 + $0x1], 0 }
   0xa   :  { %20 = vsyncpa [#allocation8], 0 }
   0xb   :  { %22 = vsyncpa [#allocation8 + $0x1], 0  ;;  %s2299_s27 = smov 0   ;;  %s2301_s28 = smov 0  }
   0xc   :  { %s2303_s29 = smov 0   ;;  %s2305_s30 = smov 0  }
   0xd LB: > { %2673 = sst [smem:[#allocation12_spill]] %s2231_s28  ;;  %s2320_s9 = sadd.s32 4294967295, %s2239_s30   ;;  %s2239_s30 = sphi %s2305_s30, %s2685_s30   ;;  %s2235_s29 = sphi %s2303_s29, %s2688_s29   ;;  %s2231_s28 = sphi %s2301_s28, %s2687_s28   ;;  %s2227_s27 = sphi %s2299_s27, %s2686_s27  }
   0xe   : > { %2674 = sst [smem:[#allocation13_spill]] %s2235_s29  ;;  %s2663_s10 = sadd.s32 4294967294, %s2239_s30  }
   0xf   : > { %s2324_s11 = sadd.s32 1, %s2239_s30   ;;  %s150_s12 = sadd.s32 1, %s2235_s29 }
  0x10   : > { %2675 = sst [smem:[#allocation14_spill]] %s2324_s11  ;;  %s147_s13 = ssub.s32 %s2239_s30, %s2324_s11 }
  0x11   : > { %p160_p0 = scmp.ne.s32.totalorder %s2235_s29, %s2231_s28  ;;  %p148_p1 = scmp.eq.s32.totalorder %s147_s13, 0 }
  0x12   : > { %p161_p2 = scmp.eq.s32.totalorder %s2320_s9, 3  ;;  %p166_p3 = scmp.ne.s32.totalorder %s2231_s28, %s2227_s27 }
  0x13   : > { %p167_p4 = scmp.eq.s32.totalorder %s2663_s10, 3  ;;  %p1760_p7 = scmp.ge.s32.totalorder %s2239_s30, 1 }
  0x14   : > { %s2337_s14 = scalar_select %p148_p1, %s2235_s29, %s150_s12  }
  0x15   : > { %p2339_p5 = por %p161_p2, %p160_p0  ;;  %p2343_p6 = por %p167_p4, %p166_p3 }
  0x16   : > { %2676 = sst [smem:[#allocation15_spill]] %s2337_s14  ;;  %p290_p8 = scmp.lt.s32.totalorder %s2239_s30, 5 }
  0x18   : > { %p291_p9 = pnand %p1760_p7, %p290_p8 }
  0x19   : > { %s1765_s17 = sshll.u32 (!%p291_p9), %s2320_s9, 1  ;;  %v2241_v0 = vmov (!%p291_p9), 1   ;;  %v2242_v1 = vmov (!%p291_p9), 0   ;;  %s2679_s1 = sld [smem:[#allocation17_spill]] (!%p291_p9)  ;;  %vm389_vm0 = vcmask (!%p291_p9), 1043456   ;;  %v2243_v39 = vmov (!%p291_p9), 2  }
  0x1a   : > { %294 = sbr.rel (%p291_p9) target bundleno = 518 (0x206), region = 40  ;;  %2077 = vset.pattern.permute.xlu1 (!%p291_p9), %v2241_v0  ;;  %2076 = vset.pattern.permute.xlu0 (!%p291_p9), %v2242_v1  ;;  %p345_p10 = scmp.lt.s32.totalorder (!%p291_p9), %s1765_s17, 7  ;;  %v2244_v41 = vmov (!%p291_p9), 3   ;;  %v366_v42 = vlaneseq (!%p291_p9)  ;;  %vm382_vm1 = vcmask (!%p291_p9), 97280   ;;  %v2245_v46 = vmov (!%p291_p9), 0.0  }
  0x1b   : > { %s2680_s4 = sld [smem:[#allocation20_spill]] (!%p291_p9)  ;;  %s2681_s0 = sld [smem:[#allocation16_spill]] (!%p291_p9) }
  0x1c   : > { %v367_v43 = vand.u32 (!%p291_p9), 127, %v366_v42  ;;  %s2682_s2 = sld [smem:[#allocation18_spill]] (!%p291_p9)  ;;  %s2683_s3 = sld [smem:[#allocation19_spill]] (!%p291_p9) }
  0x1d   : > { %s2466_s25 = sand.u32 (!%p291_p9), 1, %s2231_s28   ;;  %s1812_s10 = sshll.u32 (!%p291_p9), %s2320_s9, 6 }
  0x1e   : > { %s1761_s26 = sshll.u32 (!%p291_p9), %s2466_s25, 5  ;;  %s1763_s12 = sshll.u32 (!%p291_p9), %s2466_s25, 4 }
  0x1f   : > { %s2476_s13 = scalar_lea.vmem (!%p291_p9), [#allocation4], %s1761_s26  ;;  %s336_s19 = scalar_lea.vmem (!%p291_p9), [#allocation6], %s1763_s12 }
  0x20   : > { %s1764_s20 = sshll.u32 (!%p291_p9), %s2466_s25, 2  ;;  %s1808_s12 = sshll.u32 (!%p291_p9), %s2320_s9, 9 }
  0x21   : > { %s2690_s17 = smov (!%p345_p10, %s1765_s17), 7  ;;  %v381_v4 = vld [vmem:[%s2680_s4 + $0x8] sm:$0xf]  ;;  %v1780_v5 = vld [vmem:[%s2680_s4 + $0x18] sm:$0xf]  ;;  %v380_v6 = vld [vmem:[%s2680_s4] sm:$0xff]  ;;  %s2527_s28 = scalar_lea.hbm %s2662_s8, %s1812_s10 }
  0x22   : > { %s1766_s18 = sshll.u32 %s2690_s17, 3  ;;  %v391_v7 = vsel %vm389_vm0, %v381_v4, 0  ;;  %v1779_v8 = vld [vmem:[%s2680_s4 + $0x10] sm:$0xff]  ;;  %v917_v9 = vsel %vm389_vm0, %v1780_v5, 0  ;;  %v394_v10 = vand.u32 4294901760, %v380_v6  ;;  %s1558_s17 = sshll.u32 %s2476_s13, 4  ;;  %s2495_s17 = int_to_ptr.vmem [resolvable:$true] %s1558_s17 }
  0x23   : > { %s354_s21 = scalar_lea.vmem %s2679_s1, %s1766_s18  ;;  %v397_v11 = vand.u32 4294901760, %v391_v7  ;;  %v920_v12 = vand.u32 4294901760, %v1779_v8  ;;  %v923_v13 = vand.u32 4294901760, %v917_v9  ;;  %s348_s22 = scalar_lea.vmem %s2681_s0, %s1766_s18 }
  0x24   : > { %v362_v2 = vld [vmem:[%s354_s21] sm:$0xff]  ;;  %v363_v3 = vld [vmem:[%s354_s21 + $0x8] sm:$0xff]  ;;  %v482_v16 = vsub.f32 %v380_v6, %v394_v10  ;;  %s2483_s21 = scalar_lea.vmem [#allocation2], %s1761_s26  ;;  %s1574_s18 = sshll.u32 %s336_s19, 4  ;;  %s2497_s18 = int_to_ptr.vmem [resolvable:$true] %s1574_s18 }
  0x25   : > { %896 = vperm.xlu1 %2077, %v362_v2   ;;  %369 = vperm.xlu0 %2076, %v362_v2   ;;  %v2372_v14 = vpack.c.bf16 %v397_v11, %v394_v10  ;;  %v2374_v15 = vpack.c.bf16 %v923_v13, %v920_v12  ;;  %v489_v17 = vsub.f32 %v391_v7, %v397_v11  ;;  %v361_v38 = vld [vmem:[%s348_s22 + $0x8] sm:$0xff]  ;;  %v360_v40 = vld [vmem:[%s348_s22] sm:$0xff]  ;;  %s2486_s22 = scalar_lea.vmem [#allocation7], %s1764_s20  ;;  %s1541_s23 = sshll.u32 %s2483_s21, 4  ;;  %s2499_s23 = int_to_ptr.vmem [resolvable:$true] %s1541_s23 }
  0x26   : > { %v1008_v18 = vsub.f32 %v1779_v8, %v920_v12  ;;  %v1015_v19 = vsub.f32 %v917_v9, %v923_v13  ;;  %v483_v20 = vand.u32 4294901760, %v482_v16  ;;  %v1432_v9 = vshrl.u32 %v366_v42, 7  ;;  %v364_v11 = vld [vmem:[%s2682_s2] sm:$0xf]  ;;  %s1590_s24 = sshll.u32 %s2486_s22, 4  ;;  %s1516_s26 = sand.u32 1, %s2320_s9   ;;  %s2501_s24 = int_to_ptr.vmem [resolvable:$true] %s1590_s24 }
  0x27   : > { %1946 = vmatprep.subr.bf16.mxu0 %v2372_v14  ;;  %1970 = vmatprep.subr.bf16.mxu1 %v2374_v15  ;;  %v490_v21 = vand.u32 4294901760, %v489_v17  ;;  %v2382_v33 = vpack.c.bf16 %v489_v17, %v482_v16  ;;  %v365_v12 = vld [vmem:[%s2683_s3] sm:$0xf]  ;;  %s1811_s20 = sshll.u32 %s2320_s9, 8  ;;  %s2509_s1 = scalar_lea.hbm %s2660_s6, %s1808_s12 }
  0x28   : > { %1948 = vmatpush3.bf16.msra.mxu0 %v2372_v14  ;;  %1972 = vmatpush3.bf16.msra.mxu1 %v2374_v15  ;;  %v1009_v22 = vand.u32 4294901760, %v1008_v18  ;;  %v1016_v23 = vand.u32 4294901760, %v1015_v19  ;;  %v484_v24 = vsub.f32 %v482_v16, %v483_v20  ;;  %v2388_v35 = vpack.c.bf16 %v1015_v19, %v1008_v18  ;;  %s2514_s4 = scalar_lea.hbm %s2659_s5, %s1808_s12  ;;  %s2532_s2 = scalar_lea.sflag [#allocation5], %s1516_s26 }
  0x29   : > { %899 = vperm.xlu1 %2077, %v363_v3   ;;  %372 = vperm.xlu0 %2076, %v363_v3   ;;  %v491_v25 = vsub.f32 %v489_v17, %v490_v21  ;;  %v2390_v36 = vpack.c.bf16 %v490_v21, %v483_v20  ;;  %v1480_v10 = vsub.s32 3, %v1432_v9  ;;  %s2085_s3 = scalar_lea.vmem %s2495_s17, 512  ;;  %s2246_s12 = smov [#allocation4]  }
  0x2a   : > { %v1010_v26 = vsub.f32 %v1008_v18, %v1009_v22  ;;  %v1017_v27 = vsub.f32 %v1015_v19, %v1016_v23  ;;  %v485_v28 = vand.u32 4294901760, %v484_v24  ;;  %v2392_v37 = vpack.c.bf16 %v1016_v23, %v1009_v22  ;;  %p2086_p11 = scmp.ne.s32.totalorder %s2495_s17, %s2085_s3  ;;  %s2089_s11 = sshll.u32 %s2246_s12, 4  ;;  %s2090_s11 = int_to_ptr.vmem [resolvable:$false] %s2089_s11 }
  0x2b   : > { %v492_v29 = vand.u32 4294901760, %v491_v25  ;;  %v1481_v13 = vrot.slane %v364_v11, %v1480_v10  ;;  %v1455_v22 = vsub.s32 2, %v1432_v9  ;;  %p2092_p0 = scmp.lt.s32.totalorder %s2495_s17, %s2090_s11 }
  0x2c   : > { %v1011_v30 = vand.u32 4294901760, %v1010_v26  ;;  %v1018_v31 = vand.u32 4294901760, %v1017_v27  ;;  %p2087_p12 = pnand %p2086_p11, %p2339_p5 }
  0x2d   : > { %v2380_v32 = vpack.c.bf16 %v492_v29, %v485_v28  ;;  %2079 = vset.pattern.permute.xlu1 %v2243_v39  ;;  %2078 = vset.pattern.permute.xlu0 %v2243_v39  ;;  %v1456_v29 = vrot.slane %v364_v11, %v1455_v22 }
  0x2e   : > { %v2384_v34 = vpack.c.bf16 %v1018_v31, %v1011_v30  ;;  %1475 = vperm.xlu1 %2079, %v361_v38   ;;  %1471 = vperm.xlu0 %2078, %v360_v40   ;;  %p2088_p13 = pneg %p2087_p12 }
  0x2f   : > { %1950 = vmatprep.subr.bf16.mxu0 %v2380_v32 }
  0x30   : > { %1974 = vmatprep.subr.bf16.mxu1 %v2384_v34 }
  0x32   : > { %2080 = vset.pattern.permute.xlu1 %v2241_v0  ;;  %2081 = vset.pattern.permute.xlu0 %v2241_v0 }
  0x33   : > { %1423 = vperm.xlu1 %2080, %v360_v40   ;;  %1428 = vperm.xlu0 %2081, %v361_v38  }
  0x37   : > { %2082 = vset.pattern.permute.xlu1 %v2244_v41  ;;  %2083 = vset.pattern.permute.xlu0 %v2242_v1 }
  0x38   : > { %1446 = vperm.xlu1 %2082, %v360_v40   ;;  %1496 = vperm.xlu0 %2083, %v360_v40  }
  0x3c   : > { %1450 = vperm.xlu1 %2082, %v361_v38  }
  0x40   : > { %2084 = vset.pattern.permute.xlu1 %v2242_v1 }
  0x41   : > { %1500 = vperm.xlu1 %2084, %v361_v38  }
  0xa4   : > { %v897_v44 = vpop.permute.xlu1 %896  ;;  %v370_v45 = vpop.permute.xlu0 %369 }
  0xa5   : > { %vm901_vm2 = vcmp.eq.s32.totalorder %v897_v44, %v367_v43  ;;  %vm374_vm3 = vcmp.eq.s32.totalorder %v370_v45, %v367_v43 }
  0xa6   : > { %v2404_v47 = vsel %vm901_vm2, 1.0, %v2245_v46  ;;  %v2406_v48 = vsel %vm374_vm3, 1.0, %v2245_v46 }
  0xa7   : > { %v384_v49 = vsel %vm382_vm1, %v2406_v48, 0  ;;  %v911_v50 = vsel %vm382_vm1, %v2404_v47, 0 }
  0xa8   : > { %v900_v51 = vpop.permute.xlu1 %899  ;;  %v373_v52 = vpop.permute.xlu0 %372  ;;  %v461_v53 = vsub.f32 %v384_v49, %v384_v49  ;;  %v987_v54 = vsub.f32 %v911_v50, %v911_v50 }
  0xa9   : > { %vm902_vm4 = vcmp.eq.s32.totalorder %v900_v51, %v367_v43  ;;  %vm375_vm5 = vcmp.eq.s32.totalorder %v373_v52, %v367_v43 }
  0xaa   : > { %v2412_v55 = vsel %vm902_vm4, 1.0, %v2245_v46  ;;  %v2414_v56 = vsel %vm375_vm5, 1.0, %v2245_v46  ;;  %v462_v57 = vand.u32 4294901760, %v461_v53  ;;  %v988_v58 = vand.u32 4294901760, %v987_v54 }
  0xab   : > { %v914_v59 = vsel %vm382_vm1, %v2412_v55, 0  ;;  %v387_v60 = vsel %vm382_vm1, %v2414_v56, 0 }
  0xac   : > { %v997_v61 = vsub.f32 %v914_v59, %v914_v59  ;;  %v471_v62 = vsub.f32 %v387_v60, %v387_v60  ;;  %v463_v63 = vsub.f32 %v461_v53, %v462_v57  ;;  %v989_v0 = vsub.f32 %v987_v54, %v988_v58 }
  0xad   : > { %v1476_v16 = vpop.permute.xlu1 %1475  ;;  %v1472_v17 = vpop.permute.xlu0 %1471 }
  0xae   : > { %v464_v1 = vand.u32 4294901760, %v463_v63  ;;  %v990_v2 = vand.u32 4294901760, %v989_v0  ;;  %v472_v3 = vand.u32 4294901760, %v471_v62  ;;  %v998_v4 = vand.u32 4294901760, %v997_v61 }
  0xaf   : > { %v1483_v18 = vmul.f32 %v1481_v13, %v1476_v16  ;;  %v1482_v19 = vmul.f32 %v1481_v13, %v1472_v17 }
  0xb0   : > { %1865 = vmatprep.mubr.f32.mxu0 %v464_v1  ;;  %1907 = vmatprep.mubr.f32.mxu1 %v990_v2  ;;  %v473_v5 = vsub.f32 %v471_v62, %v472_v3  ;;  %v999_v6 = vsub.f32 %v997_v61, %v998_v4 }
  0xb2   : > { %v474_v7 = vand.u32 4294901760, %v473_v5  ;;  %v1000_v8 = vand.u32 4294901760, %v999_v6  ;;  %v1424_v25 = vpop.permute.xlu1 %1423  ;;  %v1429_v26 = vpop.permute.xlu0 %1428 }
  0xb4   : > { %1866 = vmatmul.mubr.f32.vlgmr.msra.gmra.mrb[0].mxu0 %v474_v7  ;;  %1908 = vmatmul.mubr.f32.vlgmr.msra.gmra.mrb[0].mxu1 %v1000_v8 }
  0xb5   : > { %1952 = vmatpush3.bf16.msra.mxu0 %v2380_v32  ;;  %1872 = vmatprep.mubr.msk.f32.mxu0 %vm382_vm1, %v2406_v48  ;;  %v1462_v32 = vrot.slane %v365_v12, %v1455_v22 }
  0xb6   : > { %1976 = vmatpush3.bf16.msra.mxu1 %v2384_v34  ;;  %1914 = vmatprep.mubr.msk.f32.mxu1 %vm382_vm1, %v2404_v47 }
  0xb7   : > { %1954 = vmatprep.subr.bf16.mxu0 %v2382_v33  ;;  %1978 = vmatprep.subr.bf16.mxu1 %v2388_v35  ;;  %v1497_v34 = vpop.permute.xlu0 %1496 }
  0xbc   : > { %1873 = vmatmul.mubr.msk.f32.vlgmr.msra.gmra.mrb[0].mxu0 %vm382_vm1, %v2414_v56  ;;  %1915 = vmatmul.mubr.msk.f32.vlgmr.msra.gmra.mrb[0].mxu1 %vm382_vm1, %v2412_v55 }
  0xbd   : > { %1956 = vmatpush3.bf16.msra.mxu0 %v2382_v33  ;;  %1879 = vmatprep.mubr.f32.mxu0 %v461_v53  ;;  %v1447_v33 = vpop.permute.xlu1 %1446 }
  0xbe   : > { %1980 = vmatpush3.bf16.msra.mxu1 %v2388_v35  ;;  %1921 = vmatprep.mubr.f32.mxu1 %v987_v54  ;;  %v1457_v35 = vmul.f32 %v1456_v29, %v1447_v33 }
  0xbf   : > { %1958 = vmatprep.subr.bf16.mxu0 %v2372_v14  ;;  %1982 = vmatprep.subr.bf16.mxu1 %v2374_v15 }
  0xc1   : > { %v1451_v39 = vpop.permute.xlu1 %1450 }
  0xc2   : > { %v1458_v40 = vmul.f32 %v1456_v29, %v1451_v39 }
  0xc4   : > { %1880 = vmatmul.mubr.f32.vlgmr.msra.gmra.mrb[0].mxu0 %v471_v62  ;;  %1922 = vmatmul.mubr.f32.vlgmr.msra.gmra.mrb[0].mxu1 %v997_v61  ;;  %v1464_v41 = vadd.f32 %v1462_v32, %v1458_v40 }
  0xc5   : > { %1960 = vmatpush3.bf16.msra.mxu0 %v2372_v14  ;;  %1886 = vmatprep.mubr.f32.mxu0 %v462_v57  ;;  %v1501_v42 = vpop.permute.xlu1 %1500 }
  0xc6   : > { %1984 = vmatpush3.bf16.msra.mxu1 %v2374_v15  ;;  %1928 = vmatprep.mubr.f32.mxu1 %v988_v58  ;;  %1466 = vst [vmem:[%s2483_s21 + $0x10] sm:$0xff] %v1464_v41  ;;  %v1504_v43 = vmul.f32 %v1501_v42, %v364_v11 }
  0xc7   : > { %1962 = vmatprep.subr.bf16.mxu0 %v2390_v36  ;;  %1986 = vmatprep.subr.bf16.mxu1 %v2392_v37 }
  0xc8   : > { %v1506_v44 = vadd.f32 %v1504_v43, %v365_v12 }
  0xca   : > { %1508 = vst [vmem:[%s2486_s22 + $0x2] sm:$0x1] %v1506_v44 }
  0xcc   : > { %1887 = vmatmul.mubr.f32.vlgmr.msra.gmra.mrb[0].mxu0 %v472_v3  ;;  %1929 = vmatmul.mubr.f32.vlgmr.msra.gmra.mrb[0].mxu1 %v998_v4 }
  0xcd   : > { %1964 = vmatpush3.bf16.msra.mxu0 %v2390_v36  ;;  %1893 = vmatprep.mubr.msk.f32.mxu0 %vm382_vm1, %v2406_v48  ;;  %v1503_v36 = vmul.f32 %v1497_v34, %v364_v11 }
  0xce   : > { %1988 = vmatpush3.bf16.msra.mxu1 %v2392_v37  ;;  %1935 = vmatprep.mubr.msk.f32.mxu1 %vm382_vm1, %v2404_v47  ;;  %v1463_v37 = vadd.f32 %v1462_v32, %v1457_v35 }
  0xcf   : > { %1966 = vmatprep.subr.bf16.mxu0 %v2372_v14  ;;  %1990 = vmatprep.subr.bf16.mxu1 %v2374_v15  ;;  %v1505_v38 = vadd.f32 %v1503_v36, %v365_v12 }
  0xd0   : > { %1465 = vst [vmem:[%s2483_s21] sm:$0xff] %v1463_v37 }
  0xd1   : > { %1507 = vst [vmem:[%s2486_s22] sm:$0x1] %v1505_v38 }
  0xd4   : > { %1894 = vmatmul.mubr.msk.f32.vlgmr.msra.gmra.mrb[0].mxu0 %vm382_vm1, %v2414_v56  ;;  %1936 = vmatmul.mubr.msk.f32.vlgmr.msra.gmra.mrb[0].mxu1 %vm382_vm1, %v2412_v55 }
  0xd5   : > { %1968 = vmatpush3.bf16.msra.mxu0 %v2372_v14  ;;  %1900 = vmatprep.mubr.msk.f32.mxu0 %vm382_vm1, %v2406_v48  ;;  %v1433_v14 = vsub.s32 1, %v1432_v9 }
  0xd6   : > { %1992 = vmatpush3.bf16.msra.mxu1 %v2374_v15  ;;  %1942 = vmatprep.mubr.msk.f32.mxu1 %vm382_vm1, %v2404_v47  ;;  %v1487_v15 = vrot.slane %v365_v12, %v1480_v10 }
  0xd7   : > { %v1434_v20 = vrot.slane %v364_v11, %v1433_v14  ;;  %v1440_v24 = vrot.slane %v365_v12, %v1433_v14 }
  0xd8   : > { %v1489_v21 = vadd.f32 %v1487_v15, %v1483_v18  ;;  %v1488_v23 = vadd.f32 %v1487_v15, %v1482_v19 }
  0xd9   : > { %v1435_v27 = vmul.f32 %v1434_v20, %v1424_v25  ;;  %v1436_v28 = vmul.f32 %v1434_v20, %v1429_v26 }
  0xda   : > { %1491 = vst [vmem:[%s2476_s13 + $0x10] sm:$0xff] %v1489_v21  ;;  %1490 = vst [vmem:[%s2476_s13] sm:$0xff] %v1488_v23 }
  0xdb   : > { %v1441_v30 = vadd.f32 %v1440_v24, %v1435_v27  ;;  %v1442_v31 = vadd.f32 %v1440_v24, %v1436_v28 }
  0xdc   : > { %1901 = vmatmul.mubr.msk.f32.vlgmr.msra.gmra.mrb[0].mxu0 %vm382_vm1, %v2414_v56  ;;  %1943 = vmatmul.mubr.msk.f32.vlgmr.msra.gmra.mrb[0].mxu1 %vm382_vm1, %v2412_v55 }
  0xdd   : > { %1443 = vst [vmem:[%s336_s19] sm:$0xff] %v1441_v30  ;;  %1444 = vst [vmem:[%s336_s19 + $0x8] sm:$0xff] %v1442_v31  ;;  %s2522_s19 = scalar_lea.hbm %s2661_s7, %s1811_s20  ;;  %s2091_s20 = scalar_lea.vmem %s2090_s11, 1024 }
  0xde   : > { %p2093_p1 = scmp.lt.s32.totalorder %s2091_s20, %s2085_s3 }
  0xe0   : > { %p2094_p2 = por %p2093_p1, %p2092_p0 }
  0xe2   : > { %p2095_p3 = pnand %p2094_p2, %p2088_p13 }
 0x1af   : > { %v1902_v45 = vpop.f32.mrb[0].mxu0  ;;  %v1944_v46 = vpop.f32.mrb[0].mxu1 }
 0x1b0   : > { %1790 = vst [vmem:[%s2476_s13 + $0x18] sm:$0xff] %v1902_v45  ;;  %1788 = vst [vmem:[%s2483_s21 + $0x18] sm:$0xff] %v1944_v46  ;;  %v885_v47 = vpop.f32.mrb[1].mxu0  ;;  %v1411_v48 = vpop.f32.mrb[1].mxu1 }
 0x1b1   : > { %1510 = vst [vmem:[%s2486_s22 + $0x3] sm:$0x1] %v1944_v46  ;;  %1789 = vst [vmem:[%s2476_s13 + $0x8] sm:$0xff] %v885_v47 }
 0x1b2   : > { %1787 = vst [vmem:[%s2483_s21 + $0x8] sm:$0xff] %v1411_v48  ;;  %1509 = vst [vmem:[%s2486_s22 + $0x1] sm:$0x1] %v1411_v48 }
 0x1b3   : > { %2098 = shalt.err (!%p2095_p3)
}
 0x1b4   : > { %s2099_s29 = scalar_lea.hbm %s2509_s1, 512  ;;  %s2103_s13 = scalar_lea.hbm %s2660_s6, 2048 }
 0x1b5   : > { %p2100_p4 = scmp.ne.s32.totalorder %s2509_s1, %s2099_s29  ;;  %p2104_p9 = scmp.lt.u32.totalorder %s2509_s1, %s2660_s6 }
 0x1b6   : > { %p2105_p10 = scmp.lt.u32.totalorder %s2103_s13, %s2099_s29  ;;  %p2107_p12 = scmp.lt.u32.totalorder %s2099_s29, %s2509_s1 }
 0x1b7   : > { %p2101_p7 = pnand %p2100_p4, %p2339_p5 }
 0x1b8   : > { %p2106_p11 = por %p2105_p10, %p2104_p9 }
 0x1b9   : > { %p2102_p8 = pneg %p2101_p7 }
 0x1ba   : > { %p2108_p13 = por %p2107_p12, %p2106_p11 }
 0x1bc   : > { %p2109_p0 = pnand %p2108_p13, %p2102_p8 }
 0x1be   : > { %2112 = shalt.err (!%p2109_p0)
}
 0x1bf   : > { %s2247_s22 = smov 128   ;;  %s2248_s26 = smov 8  }
 0x1c0   : > { %2014 = dma.vmem_to_hbm [thread:$0]  (%p2339_p5), %s2495_s17, 512, %s2509_s1, %s2532_s2, %s2247_s22, %s2247_s22, %s2248_s26  }
 0x1c1   : > { %s1512_s9 = scalar_lea.sflag [#allocation3], %s2466_s25  ;;  %s2113_s0 = scalar_lea.vmem %s2499_s23, 512 }
 0x1c2   : > { %p2114_p1 = scmp.ne.s32.totalorder %s2499_s23, %s2113_s0  ;;  %s2249_s3 = smov [#allocation2]  }
 0x1c3   : > { %s2117_s12 = sshll.u32 %s2249_s3, 4  ;;  %s2118_s12 = int_to_ptr.vmem [resolvable:$false] %s2117_s12 }
 0x1c4   : > { %p2115_p2 = pnand %p2114_p1, %p2339_p5  ;;  %s2119_s20 = scalar_lea.vmem %s2118_s12, 1024 }
 0x1c5   : > { %p2120_p4 = scmp.lt.s32.totalorder %s2499_s23, %s2118_s12  ;;  %p2121_p7 = scmp.lt.s32.totalorder %s2119_s20, %s2113_s0 }
 0x1c6   : > { %p2116_p3 = pneg %p2115_p2 }
 0x1c7   : > { %p2122_p8 = por %p2121_p7, %p2120_p4 }
 0x1c9   : > { %p2123_p9 = pnand %p2122_p8, %p2116_p3 }
 0x1cb   : > { %2126 = shalt.err (!%p2123_p9)
}
 0x1cc   : > { %s2127_s1 = scalar_lea.hbm %s2514_s4, 512  ;;  %s2131_s10 = scalar_lea.hbm %s2659_s5, 2048 }
 0x1cd   : > { %p2128_p10 = scmp.ne.s32.totalorder %s2514_s4, %s2127_s1  ;;  %p2132_p13 = scmp.lt.u32.totalorder %s2514_s4, %s2659_s5 }
 0x1ce   : > { %p2133_p0 = scmp.lt.u32.totalorder %s2131_s10, %s2127_s1  ;;  %p2135_p2 = scmp.lt.u32.totalorder %s2127_s1, %s2514_s4 }
 0x1cf   : > { %p2129_p11 = pnand %p2128_p10, %p2339_p5 }
 0x1d0   : > { %p2134_p1 = por %p2133_p0, %p2132_p13 }
 0x1d1   : > { %p2130_p12 = pneg %p2129_p11 }
 0x1d2   : > { %p2136_p3 = por %p2135_p2, %p2134_p1 }
 0x1d4   : > { %p2137_p4 = pnand %p2136_p3, %p2130_p12 }
 0x1d6   : > { %2140 = shalt.err (!%p2137_p4)
}
 0x1d7   : > { %2013 = dma.vmem_to_hbm [thread:$0]  (%p2339_p5), %s2499_s23, 512, %s2514_s4, %s1512_s9, %s2247_s22, %s2247_s22, %s2248_s26  }
 0x1d8   : > { %s2141_s21 = scalar_lea.vmem %s2497_s18, 256  ;;  %s2250_s11 = smov [#allocation6]  }
 0x1d9   : > { %p2142_p7 = scmp.ne.s32.totalorder %s2497_s18, %s2141_s21  ;;  %s2145_s0 = sshll.u32 %s2250_s11, 4  ;;  %s2146_s0 = int_to_ptr.vmem [resolvable:$false] %s2145_s0 }
 0x1da   : > { %s2147_s3 = scalar_lea.vmem %s2146_s0, 512  ;;  %p2148_p10 = scmp.lt.s32.totalorder %s2497_s18, %s2146_s0 }
 0x1db   : > { %p2143_p8 = pnand %p2142_p7, %p2339_p5  ;;  %p2149_p11 = scmp.lt.s32.totalorder %s2147_s3, %s2141_s21 }
 0x1dd   : > { %p2144_p9 = pneg %p2143_p8  ;;  %p2150_p12 = por %p2149_p11, %p2148_p10 }
 0x1df   : > { %p2151_p13 = pnand %p2150_p12, %p2144_p9 }
 0x1e1   : > { %2154 = shalt.err (!%p2151_p13)
}
 0x1e2   : > { %s2155_s4 = scalar_lea.hbm %s2522_s19, 256  ;;  %s2159_s12 = scalar_lea.hbm %s2661_s7, 1024 }
 0x1e3   : > { %p2156_p0 = scmp.ne.s32.totalorder %s2522_s19, %s2155_s4  ;;  %p2160_p3 = scmp.lt.u32.totalorder %s2522_s19, %s2661_s7 }
 0x1e4   : > { %p2161_p4 = scmp.lt.u32.totalorder %s2159_s12, %s2155_s4  ;;  %p2163_p8 = scmp.lt.u32.totalorder %s2155_s4, %s2522_s19 }
 0x1e5   : > { %p2157_p1 = pnand %p2156_p0, %p2339_p5 }
 0x1e6   : > { %p2162_p7 = por %p2161_p4, %p2160_p3 }
 0x1e7   : > { %p2158_p2 = pneg %p2157_p1 }
 0x1e8   : > { %p2164_p9 = por %p2163_p8, %p2162_p7 }
 0x1ea   : > { %p2165_p10 = pnand %p2164_p9, %p2158_p2 }
 0x1ec   : > { %2168 = shalt.err (!%p2165_p10)
}
 0x1ed   : > { %2015 = dma.vmem_to_hbm [thread:$0]  (%p2339_p5), %s2497_s18, 256, %s2522_s19, %s2532_s2, %s2247_s22, %s2247_s22, %s2248_s26  }
 0x1ee   : > { %s1527_s17 = scalar_lea.sflag [#allocation8], %s2466_s25  ;;  %s2169_s29 = scalar_lea.vmem %s2501_s24, 64 }
 0x1ef   : > { %p2170_p11 = scmp.ne.s32.totalorder %s2501_s24, %s2169_s29  ;;  %s2251_s10 = smov [#allocation7]  }
 0x1f0   : > { %s2173_s14 = sshll.u32 %s2251_s10, 4  ;;  %s2174_s14 = int_to_ptr.vmem [resolvable:$false] %s2173_s14 }
 0x1f1   : > { %p2171_p12 = pnand %p2170_p11, %p2339_p5  ;;  %s2175_s13 = scalar_lea.vmem %s2174_s14, 128 }
 0x1f2   : > { %p2176_p0 = scmp.lt.s32.totalorder %s2501_s24, %s2174_s14  ;;  %p2177_p1 = scmp.lt.s32.totalorder %s2175_s13, %s2169_s29 }
 0x1f3   : > { %p2172_p13 = pneg %p2171_p12 }
 0x1f4   : > { %p2178_p2 = por %p2177_p1, %p2176_p0 }
 0x1f6   : > { %p2179_p3 = pnand %p2178_p2, %p2172_p13 }
 0x1f8   : > { %2182 = shalt.err (!%p2179_p3)
}
 0x1f9   : > { %s2183_s18 = scalar_lea.hbm %s2527_s28, 64  ;;  %s2187_s22 = scalar_lea.hbm %s2662_s8, 256 }
 0x1fa   : > { %p2184_p4 = scmp.ne.s32.totalorder %s2527_s28, %s2183_s18  ;;  %p2188_p9 = scmp.lt.u32.totalorder %s2527_s28, %s2662_s8 }
 0x1fb   : > { %p2189_p10 = scmp.lt.u32.totalorder %s2187_s22, %s2183_s18  ;;  %p2191_p12 = scmp.lt.u32.totalorder %s2183_s18, %s2527_s28 }
 0x1fc   : > { %p2185_p7 = pnand %p2184_p4, %p2339_p5 }
 0x1fd   : > { %p2190_p11 = por %p2189_p10, %p2188_p9 }
 0x1fe   : > { %p2186_p8 = pneg %p2185_p7 }
 0x1ff   : > { %p2192_p13 = por %p2191_p12, %p2190_p11 }
 0x201   : > { %p2193_p0 = pnand %p2192_p13, %p2186_p8 }
 0x203   : > { %2196 = shalt.err (!%p2193_p0)
}
 0x204   : > { %s2252_s11 = smov 32   ;;  %s2253_s0 = smov 2  }
 0x205   : > { %2016 = dma.vmem_to_hbm [thread:$0]  (%p2339_p5), %s2501_s24, 64, %s2527_s28, %s1527_s17, %s2252_s11, %s2252_s11, %s2253_s0  }
 0x206 PF: > { %p2034_p1 = scmp.ge.s32.totalorder %s2239_s30, 2  ;;  %s1605_s3 = sand.u32 1, %s2227_s27  }
 0x207   : > { %s1606_s4 = scalar_lea.sflag [#allocation3], %s1605_s3 }
 0x208   : > { %p2022_p2 = pnand %p2034_p1, %p2343_p6 }
 0x20a   : > { %2214 = dma.done.wait (!%p2022_p2), %s1606_s4, 512  }
 0x20b   : > { %2216 = vsyncadd (!%p2022_p2), %s1606_s4, 4294966784  ;;  %s2684_s23 = sadd.s32 4294967294, %s2239_s30  }
 0x20c   : > { %s1614_s9 = sand.u32 1, %s2684_s23  }
 0x20d   : > { %s1615_s12 = scalar_lea.sflag [#allocation5], %s1614_s9 }
 0x20e   : > { %2218 = dma.done.wait (!%p2022_p2), %s1615_s12, 768  }
 0x20f   : > { %2220 = vsyncadd (!%p2022_p2), %s1615_s12, 4294966528  ;;  %s1633_s15 = scalar_lea.sflag [#allocation8], %s1605_s3 }
 0x210   : > { %2222 = dma.done.wait (!%p2022_p2), %s1633_s15, 64  }
 0x211   : > { %2224 = vsyncadd (!%p2022_p2), %s1633_s15, 4294967232  ;;  %s2685_s30 = sld [smem:[#allocation14_spill]]  ;;  %s2686_s27 = sld [smem:[#allocation12_spill]] }
 0x212   : > { %s2687_s28 = sld [smem:[#allocation13_spill]]  ;;  %s2688_s29 = sld [smem:[#allocation15_spill]] }
 0x217   : > { %p25_p5 = scmp.ge.s32.totalorder %s2685_s30, 6  }
 0x219   :  { %27 = sbr.rel (!%p25_p5) target bundleno = 13 (0xd), region = 130 }
 0x220   :  { %1638 = vsyncpa [#allocation3], 1 }
 0x221   :  { %1640 = vsyncpa [#allocation3 + $0x1], 1 }
 0x222   :  { %1641 = vsyncpa [#allocation5], 1 }
 0x223   :  { %1643 = vsyncpa [#allocation5 + $0x1], 1 }
 0x224   :  { %1644 = vsyncpa [#allocation8], 1 }
 0x225   :  { %1646 = vsyncpa [#allocation8 + $0x1], 1 }

</bundles_post_ra>
